<compile_context>
chip_gen: v6e
topology: v6e:2x2x1
jax: 0.10.0
libtpu: 0.0.40
codegen_flags: <defaults>
</compile_context>

<pallas_src>
import functools

import jax
import jax.numpy as jnp
import numpy as np
from jax.experimental import pallas as pl
from jax.experimental.pallas import tpu as pltpu


def _round_up(x, m):
    return (x + m - 1) // m * m


def _pick_b_tile(n, l_pad, target_lanes=512):
    """Samples packed per grid step on the lane axis (must divide n).

    Aim for >=512 matmul lanes but keep the grid >= 2 so v7x's two
    TensorCores both get work; v5e/v6e are unaffected.
    """
    ideal = max(1, target_lanes // l_pad)
    cands = [bt for bt in range(1, n + 1) if n % bt == 0 and bt <= ideal]
    good = [bt for bt in cands if (n // bt) >= 2]
    return max(good) if good else max(cands)


# -----------------------------------------------------------------------------
# Fused Pallas kernel: the whole TCN for b_tile batch samples per grid step.
# -----------------------------------------------------------------------------
def _tcn_fused_kernel(x_ref, mask_ref, w1_ref, b1_ref, w2_ref, b2_ref,
                      wds_ref, bds_ref, out_ref, buf_a, buf_b, *,
                      layers, kernel_size, b_tile, l_pad, gutter, c_buf):
    K = kernel_size
    stride = gutter + l_pad
    w_buf = b_tile * stride
    w_data = w_buf - gutter

    # Re-zero only the per-sample causal gutters (gutter << w_buf).  Done every
    # grid step so it is correct even when the "parallel" batch axis is
    # sharded across TensorCores (per-core scratch, program_id 0 not seen).
    if gutter:
        zeros_g = jnp.zeros((c_buf, gutter), jnp.float32)
        for s in range(b_tile):
            buf_a[:, s * stride:s * stride + gutter] = zeros_g
            buf_b[:, s * stride:s * stride + gutter] = zeros_g

    # Lane-dense, 128-aligned stores of the b_tile samples into their data
    # windows; the zero gutters to their left provide the causal padding.
    for s in range(b_tile):
        off = s * stride + gutter
        buf_a[:, off:off + l_pad] = x_ref[s]

    # Zeroes the inter-sample gutter columns on writeback (keeps causal pads
    # of samples 1..b_tile-1 clean).  Not needed when a single sample is packed.
    mask = mask_ref[...] if b_tile > 1 else None

    def causal_conv(src_ref, w, b, dilation, pad):
        # K shifted taps -> K small MXU matmuls accumulated in f32 (no im2col
        # concatenate copy); operands cast to bf16 for the bf16-native MXU.
        acc = b                                              # (c_buf, 1) bcast
        for k in range(K):
            start = gutter - pad + k * dilation
            tap = src_ref[:, start:start + w_data]
            acc = acc + jnp.dot(w[k].astype(jnp.bfloat16),
                                tap.astype(jnp.bfloat16),
                                preferred_element_type=jnp.float32)
        return acc                                           # (c_buf, w_data)

    n_layers = len(layers)
    for li, ly in enumerate(layers):
        d, pad = ly["dilation"], ly["pad"]

        # ---- TemporalBlock 1: causal conv + activation (dropout = identity)
        y1 = causal_conv(buf_a, w1_ref[li], b1_ref[li], d, pad)
        if ly["act1"]:
            y1 = jnp.maximum(y1, 0.0)
        buf_b[:, gutter:w_buf] = y1 if mask is None else y1 * mask

        # ---- TemporalBlock 2: causal conv + activation (none on last layer)
        y2 = causal_conv(buf_b, w2_ref[li], b2_ref[li], d, pad)
        if ly["act2"]:
            y2 = jnp.maximum(y2, 0.0)

        # ---- residual path (identity or 1x1-conv downsample)
        x_cur = buf_a[:, gutter:w_buf]
        if ly["has_ds"]:
            r = jnp.dot(wds_ref[ly["ds_idx"]].astype(jnp.bfloat16),
                        x_cur.astype(jnp.bfloat16),
                        preferred_element_type=jnp.float32) + bds_ref[ly["ds_idx"]]
        else:
            r = x_cur
        y = y2 + r                                           # (c_buf, w_data)

        if li == n_layers - 1:
            # Per-sample, lane-dense (multiple-of-128, 128-aligned) stores.
            for s in range(b_tile):
                out_ref[s] = y[:, s * stride:s * stride + l_pad].astype(out_ref.dtype)
        else:
            buf_a[:, gutter:w_buf] = y if mask is None else y * mask


# -----------------------------------------------------------------------------
# JAX wrapper: one pallas_call for the whole network.
# -----------------------------------------------------------------------------
def tcn_forward(x, params, *, kernel_size, dilation_base, use_h_activ=True):
    n, c_in0, L = x.shape
    K = kernel_size
    n_layers = len(params)

    # ---- static per-layer metadata ----
    layers = []
    c_prev, c_max, pad_max, n_ds = c_in0, c_in0, 0, 0
    for idx, p in enumerate(params):
        d = dilation_base ** idx
        pad = (K - 1) * d
        c_out = p["b1"].shape[0]
        has_ds = "wds" in p
        if not has_ds:
            assert c_prev == c_out, "identity residual requires c_in == c_out"
        layers.append(dict(c_in=c_prev, c_out=c_out, dilation=d, pad=pad,
                           has_ds=has_ds, ds_idx=n_ds if has_ds else -1,
                           act1=bool(use_h_activ),
                           act2=bool(use_h_activ) and idx != n_layers - 1))
        if has_ds:
            n_ds += 1
        c_max = max(c_max, c_out)
        pad_max = max(pad_max, pad)
        c_prev = c_out
    c_out_last = c_prev

    c_buf = max(8, _round_up(c_max, 8))      # sublane-aligned channel height
    l_pad = _round_up(L, 128)                # lane-dense, 128-aligned length
    gutter = _round_up(pad_max, 128)         # 128-aligned causal zero pad
    b_tile = _pick_b_tile(n, l_pad)          # samples packed on lane axis
    stride = gutter + l_pad
    w_buf = b_tile * stride
    w_data = w_buf - gutter
    grid = n // b_tile

    # ---- one-time parameter repack (per-tap stacked, zero-padded to c_buf) --
    def stack_conv(w, b):                    # w: (c_out, c_in, K), b: (c_out, 1)
        c_out, c_in, _ = w.shape
        wp = jnp.zeros((K, c_buf, c_buf), jnp.float32)
        wp = wp.at[:, :c_out, :c_in].set(jnp.transpose(w, (2, 0, 1)))
        bp = jnp.zeros((c_buf, 1), jnp.float32).at[:c_out].set(b)
        return wp, bp

    w1s, b1s, w2s, b2s, wdss, bdss = [], [], [], [], [], []
    for p, ly in zip(params, layers):
        w1, b1 = stack_conv(p["w1"], p["b1"]); w1s.append(w1); b1s.append(b1)
        w2, b2 = stack_conv(p["w2"], p["b2"]); w2s.append(w2); b2s.append(b2)
        if ly["has_ds"]:                     # only real downsamples are shipped
            wdss.append(jnp.zeros((c_buf, c_buf), jnp.float32).at[
                :ly["c_out"], :ly["c_in"]].set(p["wds"]))
            bdss.append(jnp.zeros((c_buf, 1), jnp.float32).at[
                :ly["c_out"]].set(p["bds"]))
    if not wdss:                             # keep specs non-empty (never read)
        wdss = [jnp.zeros((c_buf, c_buf), jnp.float32)]
        bdss = [jnp.zeros((c_buf, 1), jnp.float32)]
    w1_all, b1_all = jnp.stack(w1s), jnp.stack(b1s)
    w2_all, b2_all = jnp.stack(w2s), jnp.stack(b2s)
    wds_all, bds_all = jnp.stack(wdss), jnp.stack(bdss)

    # pad input channels to c_buf and length to l_pad (all-zero padding; causal
    # conv => the extra right columns never affect the first L outputs)
    x_pad = jnp.pad(x.astype(jnp.float32),
                    ((0, 0), (0, c_buf - c_in0), (0, l_pad - L)))

    # constant lane mask: 1 on sample data columns, 0 on inter-sample gutters
    mask_np = np.zeros((1, w_data), np.float32)
    for s in range(b_tile):
        mask_np[0, s * stride:s * stride + l_pad] = 1.0
    mask_arr = jnp.asarray(mask_np)

    # ---- explicit VMEM budget (v7x: 64 MiB physical, 32 MiB scoped default) --
    scratch_bytes = 2 * c_buf * w_buf * 4
    io_bytes = 2 * 2 * (b_tile * c_buf * l_pad * 4)      # in+out, double-buffered
    wgt_bytes = 2 * 4 * int(w1_all.size + b1_all.size + w2_all.size +
                            b2_all.size + wds_all.size + bds_all.size +
                            mask_arr.size)
    vmem_limit = int(min(100 * 1024 * 1024,
                         max(32 * 1024 * 1024,
                             2 * (scratch_bytes + io_bytes + wgt_bytes))))

    kernel = functools.partial(
        _tcn_fused_kernel, layers=tuple(layers), kernel_size=K,
        b_tile=b_tile, l_pad=l_pad, gutter=gutter, c_buf=c_buf)

    out_full = pl.pallas_call(
        kernel,
        out_shape=jax.ShapeDtypeStruct((n, c_buf, l_pad), x.dtype),
        grid_spec=pltpu.PrefetchScalarGridSpec(
            num_scalar_prefetch=0,
            grid=(grid,),
            in_specs=[
                pl.BlockSpec((b_tile, c_buf, l_pad), lambda i: (i, 0, 0)),
                pl.BlockSpec(mask_arr.shape, lambda i: (0, 0)),
                pl.BlockSpec(w1_all.shape, lambda i: (0, 0, 0, 0)),
                pl.BlockSpec(b1_all.shape, lambda i: (0, 0, 0)),
                pl.BlockSpec(w2_all.shape, lambda i: (0, 0, 0, 0)),
                pl.BlockSpec(b2_all.shape, lambda i: (0, 0, 0)),
                pl.BlockSpec(wds_all.shape, lambda i: (0, 0, 0)),
                pl.BlockSpec(bds_all.shape, lambda i: (0, 0, 0)),
            ],
            out_specs=pl.BlockSpec((b_tile, c_buf, l_pad), lambda i: (i, 0, 0)),
            scratch_shapes=[
                pltpu.VMEM((c_buf, w_buf), jnp.float32),   # padded activations A
                pltpu.VMEM((c_buf, w_buf), jnp.float32),   # padded activations B
            ],
        ),
        compiler_params=pltpu.CompilerParams(
            dimension_semantics=("parallel",),
            vmem_limit_bytes=vmem_limit),
    )(x_pad, mask_arr, w1_all, b1_all, w2_all, b2_all, wds_all, bds_all)

    # free slice in XLA: drop channel / length padding
    return out_full[:, :c_out_last, :L]


# -----------------------------------------------------------------------------
# Deterministic synthetic parameters (weight-norm applied explicitly).
# -----------------------------------------------------------------------------
def _weight_normed_conv_weight(key, c_out, c_in, k_size):
    # v ~ N(0, 0.01); weight_norm init: g = ||v||_2 over (in, k) per out channel
    v = 0.01 * jax.random.normal(key, (c_out, c_in, k_size), jnp.float32)
    norm = jnp.sqrt(jnp.sum(v * v, axis=(1, 2), keepdims=True))
    g = norm
    return g * v / norm                                  # (c_out, c_in, K)


def init_tcn_params(key, input_dim, out_dim, h_dims, kernel_size):
    layer_dims = [input_dim] + list(h_dims) + [out_dim]
    params = []
    for i in range(len(layer_dims) - 1):
        c_in, c_out = layer_dims[i], layer_dims[i + 1]
        key, k1, k2, k3, k4, k5, k6 = jax.random.split(key, 7)
        p = {
            "w1": _weight_normed_conv_weight(k1, c_out, c_in, kernel_size),
            "b1": 0.01 * jax.random.normal(k2, (c_out, 1), jnp.float32),
            "w2": _weight_normed_conv_weight(k3, c_out, c_out, kernel_size),
            "b2": 0.01 * jax.random.normal(k4, (c_out, 1), jnp.float32),
        }
        if c_in != c_out:                                # nn.Conv1d(in, out, 1)
            p["wds"] = 0.01 * jax.random.normal(k5, (c_out, c_in), jnp.float32)
            p["bds"] = 0.01 * jax.random.normal(k6, (c_out, 1), jnp.float32)
        params.append(p)
    return params


# -----------------------------------------------------------------------------
# Pure-JAX reference (same math, no Pallas) for a correctness check.
# -----------------------------------------------------------------------------
def _ref_causal_conv(x, w, b, dilation):
    n, c_in, L = x.shape
    K = w.shape[-1]
    pad = (K - 1) * dilation
    xp = jnp.pad(x, ((0, 0), (0, 0), (pad, 0)))
    out = jnp.zeros((n, w.shape[0], L), jnp.float32) + b[None]
    for k in range(K):
        out = out + jnp.einsum(
            "oc,ncl->nol", w[:, :, k], xp[:, :, k * dilation:k * dilation + L])
    return out


def tcn_forward_ref(x, params, *, kernel_size, dilation_base, use_h_activ=True):
    n_layers = len(params)
    for idx, p in enumerate(params):
        d = dilation_base ** idx
        is_last = idx == n_layers - 1
        y = _ref_causal_conv(x, p["w1"], p["b1"], d)
        if use_h_activ:
            y = jnp.maximum(y, 0.0)
        y = _ref_causal_conv(y, p["w2"], p["b2"], d)
        if use_h_activ and not is_last:
            y = jnp.maximum(y, 0.0)
        r = x if "wds" not in p else (
            jnp.einsum("oc,ncl->nol", p["wds"], x) + p["bds"][None])
        x = y + r
    return x


# -----------------------------------------------------------------------------
if __name__ == "__main__":
    # TCN(input_dim=4, out_dim=4, h_dims=[8, 8], kernel_size=2, dilation_base=2,
    #     h_activ=nn.ReLU(), batch_norm=False, dropout=0.2) in eval mode.
    batch, input_dim, out_dim, seq_len = 4, 4, 4, 16
    h_dims = [8, 8]
    kernel_size = 2
    dilation_base = 2

    key = jax.random.PRNGKey(0)
    key, k_x, k_p = jax.random.split(key, 3)
    x = jax.random.normal(k_x, (batch, input_dim, seq_len), jnp.float32)
    params = init_tcn_params(k_p, input_dim, out_dim, h_dims, kernel_size)

    fwd = jax.jit(functools.partial(
        tcn_forward, kernel_size=kernel_size, dilation_base=dilation_base,
        use_h_activ=True))
    out = jax.block_until_ready(fwd(x, params))

    ref = tcn_forward_ref(x, params, kernel_size=kernel_size,
                          dilation_base=dilation_base, use_h_activ=True)
    # bf16 MXU operands -> loosened tolerance vs the f32 reference.
    np.testing.assert_allclose(np.asarray(out), np.asarray(ref),
                               rtol=5e-2, atol=2e-3)
    assert out.shape == (batch, out_dim, seq_len)

    print("KERNEL_OK")
</pallas_src>

<mosaic_0001>
module attributes {stable_mosaic.version = 11 : i64} {
  func.func @_tcn_fused_kernel(%arg0: i32, %arg1: memref<2x8x128xf32, #tpu.memory_space<vmem>>, %arg2: memref<1x384xf32, #tpu.memory_space<vmem>>, %arg3: memref<3x2x8x8xf32, #tpu.memory_space<vmem>>, %arg4: memref<3x8x1xf32, #tpu.memory_space<vmem>>, %arg5: memref<3x2x8x8xf32, #tpu.memory_space<vmem>>, %arg6: memref<3x8x1xf32, #tpu.memory_space<vmem>>, %arg7: memref<2x8x8xf32, #tpu.memory_space<vmem>>, %arg8: memref<2x8x1xf32, #tpu.memory_space<vmem>>, %arg9: memref<2x8x128xf32, #tpu.memory_space<vmem>>, %arg10: memref<8x512xf32, #tpu.memory_space<vmem>>, %arg11: memref<8x512xf32, #tpu.memory_space<vmem>>) attributes {dimension_semantics = [#tpu.dimension_semantics<parallel>], iteration_bounds = array<i64: 2>, scalar_prefetch = 0 : i64, scratch_operands = 2 : i64, tpu.core_type = #tpu.core_type<tc>, window_params = [{transform_indices = @transform_0, window_bounds = array<i64: 2, 8, 128>}, {pipeline_mode = #tpu.pipeline_mode<synchronous>, transform_indices = @transform_1, window_bounds = array<i64: 1, 384>}, {pipeline_mode = #tpu.pipeline_mode<synchronous>, transform_indices = @transform_2, window_bounds = array<i64: 3, 2, 8, 8>}, {pipeline_mode = #tpu.pipeline_mode<synchronous>, transform_indices = @transform_3, window_bounds = array<i64: 3, 8, 1>}, {pipeline_mode = #tpu.pipeline_mode<synchronous>, transform_indices = @transform_4, window_bounds = array<i64: 3, 2, 8, 8>}, {pipeline_mode = #tpu.pipeline_mode<synchronous>, transform_indices = @transform_5, window_bounds = array<i64: 3, 8, 1>}, {pipeline_mode = #tpu.pipeline_mode<synchronous>, transform_indices = @transform_6, window_bounds = array<i64: 2, 8, 8>}, {pipeline_mode = #tpu.pipeline_mode<synchronous>, transform_indices = @transform_7, window_bounds = array<i64: 2, 8, 1>}, {transform_indices = @transform_8, window_bounds = array<i64: 2, 8, 128>}]} {
    %cst = arith.constant 0.000000e+00 : f32
    %0 = vector.broadcast %cst : f32 to vector<8x128xf32>
    %c0 = arith.constant 0 : index
    %c0_0 = arith.constant 0 : index
    %1 = vector.load %arg10[%c0, %c0_0] : memref<8x512xf32, #tpu.memory_space<vmem>>, vector<8x128xf32>
    tpu.vector_store %arg10[%c0, %c0_0], %0 {strides = array<i32>} : memref<8x512xf32, #tpu.memory_space<vmem>>, vector<8x128xf32>,
    %c0_1 = arith.constant 0 : index
    %c0_2 = arith.constant 0 : index
    %2 = vector.load %arg11[%c0_1, %c0_2] : memref<8x512xf32, #tpu.memory_space<vmem>>, vector<8x128xf32>
    tpu.vector_store %arg11[%c0_1, %c0_2], %0 {strides = array<i32>} : memref<8x512xf32, #tpu.memory_space<vmem>>, vector<8x128xf32>,
    %c0_3 = arith.constant 0 : index
    %c256 = arith.constant 256 : index
    %3 = vector.load %arg10[%c0_3, %c256] : memref<8x512xf32, #tpu.memory_space<vmem>>, vector<8x128xf32>
    tpu.vector_store %arg10[%c0_3, %c256], %0 {strides = array<i32>} : memref<8x512xf32, #tpu.memory_space<vmem>>, vector<8x128xf32>,
    %c0_4 = arith.constant 0 : index
    %c256_5 = arith.constant 256 : index
    %4 = vector.load %arg11[%c0_4, %c256_5] : memref<8x512xf32, #tpu.memory_space<vmem>>, vector<8x128xf32>
    tpu.vector_store %arg11[%c0_4, %c256_5], %0 {strides = array<i32>} : memref<8x512xf32, #tpu.memory_space<vmem>>, vector<8x128xf32>,
    %c0_6 = arith.constant 0 : index
    %c0_7 = arith.constant 0 : index
    %c0_8 = arith.constant 0 : index
    %5 = vector.load %arg1[%c0_6, %c0_7, %c0_8] : memref<2x8x128xf32, #tpu.memory_space<vmem>>, vector<1x8x128xf32>
    %6 = vector.shape_cast %5 : vector<1x8x128xf32> to vector<8x128xf32>
    %c0_9 = arith.constant 0 : index
    %c128 = arith.constant 128 : index
    %7 = vector.load %arg10[%c0_9, %c128] : memref<8x512xf32, #tpu.memory_space<vmem>>, vector<8x128xf32>
    tpu.vector_store %arg10[%c0_9, %c128], %6 {strides = array<i32>} : memref<8x512xf32, #tpu.memory_space<vmem>>, vector<8x128xf32>,
    %c1 = arith.constant 1 : index
    %c0_10 = arith.constant 0 : index
    %c0_11 = arith.constant 0 : index
    %8 = vector.load %arg1[%c1, %c0_10, %c0_11] : memref<2x8x128xf32, #tpu.memory_space<vmem>>, vector<1x8x128xf32>
    %9 = vector.shape_cast %8 : vector<1x8x128xf32> to vector<8x128xf32>
    %c0_12 = arith.constant 0 : index
    %c384 = arith.constant 384 : index
    %10 = vector.load %arg10[%c0_12, %c384] : memref<8x512xf32, #tpu.memory_space<vmem>>, vector<8x128xf32>
    tpu.vector_store %arg10[%c0_12, %c384], %9 {strides = array<i32>} : memref<8x512xf32, #tpu.memory_space<vmem>>, vector<8x128xf32>,
    %c0_13 = arith.constant 0 : index
    %c0_14 = arith.constant 0 : index
    %11 = vector.load %arg2[%c0_13, %c0_14] : memref<1x384xf32, #tpu.memory_space<vmem>>, vector<1x384xf32>
    %c0_15 = arith.constant 0 : index
    %c0_16 = arith.constant 0 : index
    %c0_17 = arith.constant 0 : index
    %c0_18 = arith.constant 0 : index
    %12 = vector.load %arg3[%c0_15, %c0_16, %c0_17, %c0_18] : memref<3x2x8x8xf32, #tpu.memory_space<vmem>>, vector<1x2x8x8xf32>
    %13 = vector.shape_cast %12 : vector<1x2x8x8xf32> to vector<2x8x8xf32>
    %c0_19 = arith.constant 0 : index
    %c0_20 = arith.constant 0 : index
    %c0_21 = arith.constant 0 : index
    %14 = vector.load %arg4[%c0_19, %c0_20, %c0_21] : memref<3x8x1xf32, #tpu.memory_space<vmem>>, vector<1x8x1xf32>
    %15 = vector.shape_cast %14 : vector<1x8x1xf32> to vector<8x1xf32>
    %c0_22 = arith.constant 0 : index
    %c127 = arith.constant 127 : index
    %16 = vector.load %arg10[%c0_22, %c127] : memref<8x512xf32, #tpu.memory_space<vmem>>, vector<8x384xf32>
    %17 = vector.extract_strided_slice %13 {offsets = [0, 0, 0], sizes = [1, 8, 8], strides = [1, 1, 1]} : vector<2x8x8xf32> to vector<1x8x8xf32>
    %18 = vector.shape_cast %17 : vector<1x8x8xf32> to vector<8x8xf32>
    %19 = arith.truncf %18 : vector<8x8xf32> to vector<8x8xbf16>
    %20 = arith.truncf %16 : vector<8x384xf32> to vector<8x384xbf16>
    %cst_23 = arith.constant dense<0.000000e+00> : vector<8x384xf32>
    %21 = tpu.matmul %19, %20, %cst_23 {dimension_numbers = #tpu.dot_dimension_numbers<[1], [0], [0], [1], [0, 0, 1, 1], [], []>} : vector<8x8xbf16>, vector<8x384xbf16>, vector<8x384xf32> -> vector<8x384xf32>
    %22 = vector.broadcast %15 : vector<8x1xf32> to vector<8x384xf32>
    %23 = arith.addf %22, %21 : vector<8x384xf32>
    %c0_24 = arith.constant 0 : index
    %c128_25 = arith.constant 128 : index
    %24 = vector.load %arg10[%c0_24, %c128_25] : memref<8x512xf32, #tpu.memory_space<vmem>>, vector<8x384xf32>
    %25 = vector.extract_strided_slice %13 {offsets = [1, 0, 0], sizes = [1, 8, 8], strides = [1, 1, 1]} : vector<2x8x8xf32> to vector<1x8x8xf32>
    %26 = vector.shape_cast %25 : vector<1x8x8xf32> to vector<8x8xf32>
    %27 = arith.truncf %26 : vector<8x8xf32> to vector<8x8xbf16>
    %28 = arith.truncf %24 : vector<8x384xf32> to vector<8x384xbf16>
    %cst_26 = arith.constant dense<0.000000e+00> : vector<8x384xf32>
    %29 = tpu.matmul %27, %28, %cst_26 {dimension_numbers = #tpu.dot_dimension_numbers<[1], [0], [0], [1], [0, 0, 1, 1], [], []>} : vector<8x8xbf16>, vector<8x384xbf16>, vector<8x384xf32> -> vector<8x384xf32>
    %30 = arith.addf %23, %29 : vector<8x384xf32>
    %cst_27 = arith.constant 0.000000e+00 : f32
    %31 = vector.broadcast %cst_27 : f32 to vector<8x384xf32>
    %32 = arith.maximumf %30, %31 : vector<8x384xf32>
    %33 = vector.broadcast %11 : vector<1x384xf32> to vector<8x384xf32>
    %34 = arith.mulf %32, %33 : vector<8x384xf32>
    %c0_28 = arith.constant 0 : index
    %c128_29 = arith.constant 128 : index
    %35 = vector.load %arg11[%c0_28, %c128_29] : memref<8x512xf32, #tpu.memory_space<vmem>>, vector<8x384xf32>
    tpu.vector_store %arg11[%c0_28, %c128_29], %34 {strides = array<i32>} : memref<8x512xf32, #tpu.memory_space<vmem>>, vector<8x384xf32>,
    %c0_30 = arith.constant 0 : index
    %c0_31 = arith.constant 0 : index
    %c0_32 = arith.constant 0 : index
    %c0_33 = arith.constant 0 : index
    %36 = vector.load %arg5[%c0_30, %c0_31, %c0_32, %c0_33] : memref<3x2x8x8xf32, #tpu.memory_space<vmem>>, vector<1x2x8x8xf32>
    %37 = vector.shape_cast %36 : vector<1x2x8x8xf32> to vector<2x8x8xf32>
    %c0_34 = arith.constant 0 : index
    %c0_35 = arith.constant 0 : index
    %c0_36 = arith.constant 0 : index
    %38 = vector.load %arg6[%c0_34, %c0_35, %c0_36] : memref<3x8x1xf32, #tpu.memory_space<vmem>>, vector<1x8x1xf32>
    %39 = vector.shape_cast %38 : vector<1x8x1xf32> to vector<8x1xf32>
    %c0_37 = arith.constant 0 : index
    %c127_38 = arith.constant 127 : index
    %40 = vector.load %arg11[%c0_37, %c127_38] : memref<8x512xf32, #tpu.memory_space<vmem>>, vector<8x384xf32>
    %41 = vector.extract_strided_slice %37 {offsets = [0, 0, 0], sizes = [1, 8, 8], strides = [1, 1, 1]} : vector<2x8x8xf32> to vector<1x8x8xf32>
    %42 = vector.shape_cast %41 : vector<1x8x8xf32> to vector<8x8xf32>
    %43 = arith.truncf %42 : vector<8x8xf32> to vector<8x8xbf16>
    %44 = arith.truncf %40 : vector<8x384xf32> to vector<8x384xbf16>
    %cst_39 = arith.constant dense<0.000000e+00> : vector<8x384xf32>
    %45 = tpu.matmul %43, %44, %cst_39 {dimension_numbers = #tpu.dot_dimension_numbers<[1], [0], [0], [1], [0, 0, 1, 1], [], []>} : vector<8x8xbf16>, vector<8x384xbf16>, vector<8x384xf32> -> vector<8x384xf32>
    %46 = vector.broadcast %39 : vector<8x1xf32> to vector<8x384xf32>
    %47 = arith.addf %46, %45 : vector<8x384xf32>
    %c0_40 = arith.constant 0 : index
    %c128_41 = arith.constant 128 : index
    %48 = vector.load %arg11[%c0_40, %c128_41] : memref<8x512xf32, #tpu.memory_space<vmem>>, vector<8x384xf32>
    %49 = vector.extract_strided_slice %37 {offsets = [1, 0, 0], sizes = [1, 8, 8], strides = [1, 1, 1]} : vector<2x8x8xf32> to vector<1x8x8xf32>
    %50 = vector.shape_cast %49 : vector<1x8x8xf32> to vector<8x8xf32>
    %51 = arith.truncf %50 : vector<8x8xf32> to vector<8x8xbf16>
    %52 = arith.truncf %48 : vector<8x384xf32> to vector<8x384xbf16>
    %cst_42 = arith.constant dense<0.000000e+00> : vector<8x384xf32>
    %53 = tpu.matmul %51, %52, %cst_42 {dimension_numbers = #tpu.dot_dimension_numbers<[1], [0], [0], [1], [0, 0, 1, 1], [], []>} : vector<8x8xbf16>, vector<8x384xbf16>, vector<8x384xf32> -> vector<8x384xf32>
    %54 = arith.addf %47, %53 : vector<8x384xf32>
    %cst_43 = arith.constant 0.000000e+00 : f32
    %55 = vector.broadcast %cst_43 : f32 to vector<8x384xf32>
    %56 = arith.maximumf %54, %55 : vector<8x384xf32>
    %c0_44 = arith.constant 0 : index
    %c128_45 = arith.constant 128 : index
    %57 = vector.load %arg10[%c0_44, %c128_45] : memref<8x512xf32, #tpu.memory_space<vmem>>, vector<8x384xf32>
    %c0_46 = arith.constant 0 : index
    %c0_47 = arith.constant 0 : index
    %c0_48 = arith.constant 0 : index
    %58 = vector.load %arg7[%c0_46, %c0_47, %c0_48] : memref<2x8x8xf32, #tpu.memory_space<vmem>>, vector<1x8x8xf32>
    %59 = vector.shape_cast %58 : vector<1x8x8xf32> to vector<8x8xf32>
    %60 = arith.truncf %59 : vector<8x8xf32> to vector<8x8xbf16>
    %61 = arith.truncf %57 : vector<8x384xf32> to vector<8x384xbf16>
    %cst_49 = arith.constant dense<0.000000e+00> : vector<8x384xf32>
    %62 = tpu.matmul %60, %61, %cst_49 {dimension_numbers = #tpu.dot_dimension_numbers<[1], [0], [0], [1], [0, 0, 1, 1], [], []>} : vector<8x8xbf16>, vector<8x384xbf16>, vector<8x384xf32> -> vector<8x384xf32>
    %c0_50 = arith.constant 0 : index
    %c0_51 = arith.constant 0 : index
    %c0_52 = arith.constant 0 : index
    %63 = vector.load %arg8[%c0_50, %c0_51, %c0_52] : memref<2x8x1xf32, #tpu.memory_space<vmem>>, vector<1x8x1xf32>
    %64 = vector.shape_cast %63 : vector<1x8x1xf32> to vector<8x1xf32>
    %65 = vector.broadcast %64 : vector<8x1xf32> to vector<8x384xf32>
    %66 = arith.addf %62, %65 : vector<8x384xf32>
    %67 = arith.addf %56, %66 : vector<8x384xf32>
    %68 = vector.broadcast %11 : vector<1x384xf32> to vector<8x384xf32>
    %69 = arith.mulf %67, %68 : vector<8x384xf32>
    %c0_53 = arith.constant 0 : index
    %c128_54 = arith.constant 128 : index
    %70 = vector.load %arg10[%c0_53, %c128_54] : memref<8x512xf32, #tpu.memory_space<vmem>>, vector<8x384xf32>
    tpu.vector_store %arg10[%c0_53, %c128_54], %69 {strides = array<i32>} : memref<8x512xf32, #tpu.memory_space<vmem>>, vector<8x384xf32>,
    %c1_55 = arith.constant 1 : index
    %c0_56 = arith.constant 0 : index
    %c0_57 = arith.constant 0 : index
    %c0_58 = arith.constant 0 : index
    %71 = vector.load %arg3[%c1_55, %c0_56, %c0_57, %c0_58] : memref<3x2x8x8xf32, #tpu.memory_space<vmem>>, vector<1x2x8x8xf32>
    %72 = vector.shape_cast %71 : vector<1x2x8x8xf32> to vector<2x8x8xf32>
    %c1_59 = arith.constant 1 : index
    %c0_60 = arith.constant 0 : index
    %c0_61 = arith.constant 0 : index
    %73 = vector.load %arg4[%c1_59, %c0_60, %c0_61] : memref<3x8x1xf32, #tpu.memory_space<vmem>>, vector<1x8x1xf32>
    %74 = vector.shape_cast %73 : vector<1x8x1xf32> to vector<8x1xf32>
    %c0_62 = arith.constant 0 : index
    %c126 = arith.constant 126 : index
    %75 = vector.load %arg10[%c0_62, %c126] : memref<8x512xf32, #tpu.memory_space<vmem>>, vector<8x384xf32>
    %76 = vector.extract_strided_slice %72 {offsets = [0, 0, 0], sizes = [1, 8, 8], strides = [1, 1, 1]} : vector<2x8x8xf32> to vector<1x8x8xf32>
    %77 = vector.shape_cast %76 : vector<1x8x8xf32> to vector<8x8xf32>
    %78 = arith.truncf %77 : vector<8x8xf32> to vector<8x8xbf16>
    %79 = arith.truncf %75 : vector<8x384xf32> to vector<8x384xbf16>
    %cst_63 = arith.constant dense<0.000000e+00> : vector<8x384xf32>
    %80 = tpu.matmul %78, %79, %cst_63 {dimension_numbers = #tpu.dot_dimension_numbers<[1], [0], [0], [1], [0, 0, 1, 1], [], []>} : vector<8x8xbf16>, vector<8x384xbf16>, vector<8x384xf32> -> vector<8x384xf32>
    %81 = vector.broadcast %74 : vector<8x1xf32> to vector<8x384xf32>
    %82 = arith.addf %81, %80 : vector<8x384xf32>
    %c0_64 = arith.constant 0 : index
    %c128_65 = arith.constant 128 : index
    %83 = vector.load %arg10[%c0_64, %c128_65] : memref<8x512xf32, #tpu.memory_space<vmem>>, vector<8x384xf32>
    %84 = vector.extract_strided_slice %72 {offsets = [1, 0, 0], sizes = [1, 8, 8], strides = [1, 1, 1]} : vector<2x8x8xf32> to vector<1x8x8xf32>
    %85 = vector.shape_cast %84 : vector<1x8x8xf32> to vector<8x8xf32>
    %86 = arith.truncf %85 : vector<8x8xf32> to vector<8x8xbf16>
    %87 = arith.truncf %83 : vector<8x384xf32> to vector<8x384xbf16>
    %cst_66 = arith.constant dense<0.000000e+00> : vector<8x384xf32>
    %88 = tpu.matmul %86, %87, %cst_66 {dimension_numbers = #tpu.dot_dimension_numbers<[1], [0], [0], [1], [0, 0, 1, 1], [], []>} : vector<8x8xbf16>, vector<8x384xbf16>, vector<8x384xf32> -> vector<8x384xf32>
    %89 = arith.addf %82, %88 : vector<8x384xf32>
    %cst_67 = arith.constant 0.000000e+00 : f32
    %90 = vector.broadcast %cst_67 : f32 to vector<8x384xf32>
    %91 = arith.maximumf %89, %90 : vector<8x384xf32>
    %92 = vector.broadcast %11 : vector<1x384xf32> to vector<8x384xf32>
    %93 = arith.mulf %91, %92 : vector<8x384xf32>
    %c0_68 = arith.constant 0 : index
    %c128_69 = arith.constant 128 : index
    %94 = vector.load %arg11[%c0_68, %c128_69] : memref<8x512xf32, #tpu.memory_space<vmem>>, vector<8x384xf32>
    tpu.vector_store %arg11[%c0_68, %c128_69], %93 {strides = array<i32>} : memref<8x512xf32, #tpu.memory_space<vmem>>, vector<8x384xf32>,
    %c1_70 = arith.constant 1 : index
    %c0_71 = arith.constant 0 : index
    %c0_72 = arith.constant 0 : index
    %c0_73 = arith.constant 0 : index
    %95 = vector.load %arg5[%c1_70, %c0_71, %c0_72, %c0_73] : memref<3x2x8x8xf32, #tpu.memory_space<vmem>>, vector<1x2x8x8xf32>
    %96 = vector.shape_cast %95 : vector<1x2x8x8xf32> to vector<2x8x8xf32>
    %c1_74 = arith.constant 1 : index
    %c0_75 = arith.constant 0 : index
    %c0_76 = arith.constant 0 : index
    %97 = vector.load %arg6[%c1_74, %c0_75, %c0_76] : memref<3x8x1xf32, #tpu.memory_space<vmem>>, vector<1x8x1xf32>
    %98 = vector.shape_cast %97 : vector<1x8x1xf32> to vector<8x1xf32>
    %c0_77 = arith.constant 0 : index
    %c126_78 = arith.constant 126 : index
    %99 = vector.load %arg11[%c0_77, %c126_78] : memref<8x512xf32, #tpu.memory_space<vmem>>, vector<8x384xf32>
    %100 = vector.extract_strided_slice %96 {offsets = [0, 0, 0], sizes = [1, 8, 8], strides = [1, 1, 1]} : vector<2x8x8xf32> to vector<1x8x8xf32>
    %101 = vector.shape_cast %100 : vector<1x8x8xf32> to vector<8x8xf32>
    %102 = arith.truncf %101 : vector<8x8xf32> to vector<8x8xbf16>
    %103 = arith.truncf %99 : vector<8x384xf32> to vector<8x384xbf16>
    %cst_79 = arith.constant dense<0.000000e+00> : vector<8x384xf32>
    %104 = tpu.matmul %102, %103, %cst_79 {dimension_numbers = #tpu.dot_dimension_numbers<[1], [0], [0], [1], [0, 0, 1, 1], [], []>} : vector<8x8xbf16>, vector<8x384xbf16>, vector<8x384xf32> -> vector<8x384xf32>
    %105 = vector.broadcast %98 : vector<8x1xf32> to vector<8x384xf32>
    %106 = arith.addf %105, %104 : vector<8x384xf32>
    %c0_80 = arith.constant 0 : index
    %c128_81 = arith.constant 128 : index
    %107 = vector.load %arg11[%c0_80, %c128_81] : memref<8x512xf32, #tpu.memory_space<vmem>>, vector<8x384xf32>
    %108 = vector.extract_strided_slice %96 {offsets = [1, 0, 0], sizes = [1, 8, 8], strides = [1, 1, 1]} : vector<2x8x8xf32> to vector<1x8x8xf32>
    %109 = vector.shape_cast %108 : vector<1x8x8xf32> to vector<8x8xf32>
    %110 = arith.truncf %109 : vector<8x8xf32> to vector<8x8xbf16>
    %111 = arith.truncf %107 : vector<8x384xf32> to vector<8x384xbf16>
    %cst_82 = arith.constant dense<0.000000e+00> : vector<8x384xf32>
    %112 = tpu.matmul %110, %111, %cst_82 {dimension_numbers = #tpu.dot_dimension_numbers<[1], [0], [0], [1], [0, 0, 1, 1], [], []>} : vector<8x8xbf16>, vector<8x384xbf16>, vector<8x384xf32> -> vector<8x384xf32>
    %113 = arith.addf %106, %112 : vector<8x384xf32>
    %cst_83 = arith.constant 0.000000e+00 : f32
    %114 = vector.broadcast %cst_83 : f32 to vector<8x384xf32>
    %115 = arith.maximumf %113, %114 : vector<8x384xf32>
    %c0_84 = arith.constant 0 : index
    %c128_85 = arith.constant 128 : index
    %116 = vector.load %arg10[%c0_84, %c128_85] : memref<8x512xf32, #tpu.memory_space<vmem>>, vector<8x384xf32>
    %117 = arith.addf %115, %116 : vector<8x384xf32>
    %118 = vector.broadcast %11 : vector<1x384xf32> to vector<8x384xf32>
    %119 = arith.mulf %117, %118 : vector<8x384xf32>
    %c0_86 = arith.constant 0 : index
    %c128_87 = arith.constant 128 : index
    %120 = vector.load %arg10[%c0_86, %c128_87] : memref<8x512xf32, #tpu.memory_space<vmem>>, vector<8x384xf32>
    tpu.vector_store %arg10[%c0_86, %c128_87], %119 {strides = array<i32>} : memref<8x512xf32, #tpu.memory_space<vmem>>, vector<8x384xf32>,
    %c2 = arith.constant 2 : index
    %c0_88 = arith.constant 0 : index
    %c0_89 = arith.constant 0 : index
    %c0_90 = arith.constant 0 : index
    %121 = vector.load %arg3[%c2, %c0_88, %c0_89, %c0_90] : memref<3x2x8x8xf32, #tpu.memory_space<vmem>>, vector<1x2x8x8xf32>
    %122 = vector.shape_cast %121 : vector<1x2x8x8xf32> to vector<2x8x8xf32>
    %c2_91 = arith.constant 2 : index
    %c0_92 = arith.constant 0 : index
    %c0_93 = arith.constant 0 : index
    %123 = vector.load %arg4[%c2_91, %c0_92, %c0_93] : memref<3x8x1xf32, #tpu.memory_space<vmem>>, vector<1x8x1xf32>
    %124 = vector.shape_cast %123 : vector<1x8x1xf32> to vector<8x1xf32>
    %c0_94 = arith.constant 0 : index
    %c124 = arith.constant 124 : index
    %125 = vector.load %arg10[%c0_94, %c124] : memref<8x512xf32, #tpu.memory_space<vmem>>, vector<8x384xf32>
    %126 = vector.extract_strided_slice %122 {offsets = [0, 0, 0], sizes = [1, 8, 8], strides = [1, 1, 1]} : vector<2x8x8xf32> to vector<1x8x8xf32>
    %127 = vector.shape_cast %126 : vector<1x8x8xf32> to vector<8x8xf32>
    %128 = arith.truncf %127 : vector<8x8xf32> to vector<8x8xbf16>
    %129 = arith.truncf %125 : vector<8x384xf32> to vector<8x384xbf16>
    %cst_95 = arith.constant dense<0.000000e+00> : vector<8x384xf32>
    %130 = tpu.matmul %128, %129, %cst_95 {dimension_numbers = #tpu.dot_dimension_numbers<[1], [0], [0], [1], [0, 0, 1, 1], [], []>} : vector<8x8xbf16>, vector<8x384xbf16>, vector<8x384xf32> -> vector<8x384xf32>
    %131 = vector.broadcast %124 : vector<8x1xf32> to vector<8x384xf32>
    %132 = arith.addf %131, %130 : vector<8x384xf32>
    %c0_96 = arith.constant 0 : index
    %c128_97 = arith.constant 128 : index
    %133 = vector.load %arg10[%c0_96, %c128_97] : memref<8x512xf32, #tpu.memory_space<vmem>>, vector<8x384xf32>
    %134 = vector.extract_strided_slice %122 {offsets = [1, 0, 0], sizes = [1, 8, 8], strides = [1, 1, 1]} : vector<2x8x8xf32> to vector<1x8x8xf32>
    %135 = vector.shape_cast %134 : vector<1x8x8xf32> to vector<8x8xf32>
    %136 = arith.truncf %135 : vector<8x8xf32> to vector<8x8xbf16>
    %137 = arith.truncf %133 : vector<8x384xf32> to vector<8x384xbf16>
    %cst_98 = arith.constant dense<0.000000e+00> : vector<8x384xf32>
    %138 = tpu.matmul %136, %137, %cst_98 {dimension_numbers = #tpu.dot_dimension_numbers<[1], [0], [0], [1], [0, 0, 1, 1], [], []>} : vector<8x8xbf16>, vector<8x384xbf16>, vector<8x384xf32> -> vector<8x384xf32>
    %139 = arith.addf %132, %138 : vector<8x384xf32>
    %cst_99 = arith.constant 0.000000e+00 : f32
    %140 = vector.broadcast %cst_99 : f32 to vector<8x384xf32>
    %141 = arith.maximumf %139, %140 : vector<8x384xf32>
    %142 = vector.broadcast %11 : vector<1x384xf32> to vector<8x384xf32>
    %143 = arith.mulf %141, %142 : vector<8x384xf32>
    %c0_100 = arith.constant 0 : index
    %c128_101 = arith.constant 128 : index
    %144 = vector.load %arg11[%c0_100, %c128_101] : memref<8x512xf32, #tpu.memory_space<vmem>>, vector<8x384xf32>
    tpu.vector_store %arg11[%c0_100, %c128_101], %143 {strides = array<i32>} : memref<8x512xf32, #tpu.memory_space<vmem>>, vector<8x384xf32>,
    %c2_102 = arith.constant 2 : index
    %c0_103 = arith.constant 0 : index
    %c0_104 = arith.constant 0 : index
    %c0_105 = arith.constant 0 : index
    %145 = vector.load %arg5[%c2_102, %c0_103, %c0_104, %c0_105] : memref<3x2x8x8xf32, #tpu.memory_space<vmem>>, vector<1x2x8x8xf32>
    %146 = vector.shape_cast %145 : vector<1x2x8x8xf32> to vector<2x8x8xf32>
    %c2_106 = arith.constant 2 : index
    %c0_107 = arith.constant 0 : index
    %c0_108 = arith.constant 0 : index
    %147 = vector.load %arg6[%c2_106, %c0_107, %c0_108] : memref<3x8x1xf32, #tpu.memory_space<vmem>>, vector<1x8x1xf32>
    %148 = vector.shape_cast %147 : vector<1x8x1xf32> to vector<8x1xf32>
    %c0_109 = arith.constant 0 : index
    %c124_110 = arith.constant 124 : index
    %149 = vector.load %arg11[%c0_109, %c124_110] : memref<8x512xf32, #tpu.memory_space<vmem>>, vector<8x384xf32>
    %150 = vector.extract_strided_slice %146 {offsets = [0, 0, 0], sizes = [1, 8, 8], strides = [1, 1, 1]} : vector<2x8x8xf32> to vector<1x8x8xf32>
    %151 = vector.shape_cast %150 : vector<1x8x8xf32> to vector<8x8xf32>
    %152 = arith.truncf %151 : vector<8x8xf32> to vector<8x8xbf16>
    %153 = arith.truncf %149 : vector<8x384xf32> to vector<8x384xbf16>
    %cst_111 = arith.constant dense<0.000000e+00> : vector<8x384xf32>
    %154 = tpu.matmul %152, %153, %cst_111 {dimension_numbers = #tpu.dot_dimension_numbers<[1], [0], [0], [1], [0, 0, 1, 1], [], []>} : vector<8x8xbf16>, vector<8x384xbf16>, vector<8x384xf32> -> vector<8x384xf32>
    %155 = vector.broadcast %148 : vector<8x1xf32> to vector<8x384xf32>
    %156 = arith.addf %155, %154 : vector<8x384xf32>
    %c0_112 = arith.constant 0 : index
    %c128_113 = arith.constant 128 : index
    %157 = vector.load %arg11[%c0_112, %c128_113] : memref<8x512xf32, #tpu.memory_space<vmem>>, vector<8x384xf32>
    %158 = vector.extract_strided_slice %146 {offsets = [1, 0, 0], sizes = [1, 8, 8], strides = [1, 1, 1]} : vector<2x8x8xf32> to vector<1x8x8xf32>
    %159 = vector.shape_cast %158 : vector<1x8x8xf32> to vector<8x8xf32>
    %160 = arith.truncf %159 : vector<8x8xf32> to vector<8x8xbf16>
    %161 = arith.truncf %157 : vector<8x384xf32> to vector<8x384xbf16>
    %cst_114 = arith.constant dense<0.000000e+00> : vector<8x384xf32>
    %162 = tpu.matmul %160, %161, %cst_114 {dimension_numbers = #tpu.dot_dimension_numbers<[1], [0], [0], [1], [0, 0, 1, 1], [], []>} : vector<8x8xbf16>, vector<8x384xbf16>, vector<8x384xf32> -> vector<8x384xf32>
    %163 = arith.addf %156, %162 : vector<8x384xf32>
    %c0_115 = arith.constant 0 : index
    %c128_116 = arith.constant 128 : index
    %164 = vector.load %arg10[%c0_115, %c128_116] : memref<8x512xf32, #tpu.memory_space<vmem>>, vector<8x384xf32>
    %c1_117 = arith.constant 1 : index
    %c0_118 = arith.constant 0 : index
    %c0_119 = arith.constant 0 : index
    %165 = vector.load %arg7[%c1_117, %c0_118, %c0_119] : memref<2x8x8xf32, #tpu.memory_space<vmem>>, vector<1x8x8xf32>
    %166 = vector.shape_cast %165 : vector<1x8x8xf32> to vector<8x8xf32>
    %167 = arith.truncf %166 : vector<8x8xf32> to vector<8x8xbf16>
    %168 = arith.truncf %164 : vector<8x384xf32> to vector<8x384xbf16>
    %cst_120 = arith.constant dense<0.000000e+00> : vector<8x384xf32>
    %169 = tpu.matmul %167, %168, %cst_120 {dimension_numbers = #tpu.dot_dimension_numbers<[1], [0], [0], [1], [0, 0, 1, 1], [], []>} : vector<8x8xbf16>, vector<8x384xbf16>, vector<8x384xf32> -> vector<8x384xf32>
    %c1_121 = arith.constant 1 : index
    %c0_122 = arith.constant 0 : index
    %c0_123 = arith.constant 0 : index
    %170 = vector.load %arg8[%c1_121, %c0_122, %c0_123] : memref<2x8x1xf32, #tpu.memory_space<vmem>>, vector<1x8x1xf32>
    %171 = vector.shape_cast %170 : vector<1x8x1xf32> to vector<8x1xf32>
    %172 = vector.broadcast %171 : vector<8x1xf32> to vector<8x384xf32>
    %173 = arith.addf %169, %172 : vector<8x384xf32>
    %174 = arith.addf %163, %173 : vector<8x384xf32>
    %175 = vector.extract_strided_slice %174 {offsets = [0, 0], sizes = [8, 128], strides = [1, 1]} : vector<8x384xf32> to vector<8x128xf32>
    %c0_124 = arith.constant 0 : index
    %c0_125 = arith.constant 0 : index
    %c0_126 = arith.constant 0 : index
    %176 = vector.load %arg9[%c0_124, %c0_125, %c0_126] : memref<2x8x128xf32, #tpu.memory_space<vmem>>, vector<1x8x128xf32>
    %177 = vector.shape_cast %176 : vector<1x8x128xf32> to vector<8x128xf32>
    %178 = vector.shape_cast %175 : vector<8x128xf32> to vector<1x8x128xf32>
    tpu.vector_store %arg9[%c0_124, %c0_125, %c0_126], %178 {strides = array<i32>} : memref<2x8x128xf32, #tpu.memory_space<vmem>>, vector<1x8x128xf32>,
    %179 = vector.extract_strided_slice %174 {offsets = [0, 256], sizes = [8, 128], strides = [1, 1]} : vector<8x384xf32> to vector<8x128xf32>
    %c1_127 = arith.constant 1 : index
    %c0_128 = arith.constant 0 : index
    %c0_129 = arith.constant 0 : index
    %180 = vector.load %arg9[%c1_127, %c0_128, %c0_129] : memref<2x8x128xf32, #tpu.memory_space<vmem>>, vector<1x8x128xf32>
    %181 = vector.shape_cast %180 : vector<1x8x128xf32> to vector<8x128xf32>
    %182 = vector.shape_cast %179 : vector<8x128xf32> to vector<1x8x128xf32>
    tpu.vector_store %arg9[%c1_127, %c0_128, %c0_129], %182 {strides = array<i32>} : memref<2x8x128xf32, #tpu.memory_space<vmem>>, vector<1x8x128xf32>,
    return
  }
  func.func @transform_0(%arg0: i32) -> (i32, i32, i32) {
    %c0_i32 = arith.constant 0 : i32
    %c0_i32_0 = arith.constant 0 : i32
    %c0_i32_1 = arith.constant 0 : i32
    return %arg0, %c0_i32, %c0_i32_0 : i32, i32, i32
  }
  func.func @transform_1(%arg0: i32) -> (i32, i32) {
    %c0_i32 = arith.constant 0 : i32
    %c0_i32_0 = arith.constant 0 : i32
    %c0_i32_1 = arith.constant 0 : i32
    return %c0_i32, %c0_i32_0 : i32, i32
  }
  func.func @transform_2(%arg0: i32) -> (i32, i32, i32, i32) {
    %c0_i32 = arith.constant 0 : i32
    %c0_i32_0 = arith.constant 0 : i32
    %c0_i32_1 = arith.constant 0 : i32
    %c0_i32_2 = arith.constant 0 : i32
    %c0_i32_3 = arith.constant 0 : i32
    return %c0_i32, %c0_i32_0, %c0_i32_1, %c0_i32_2 : i32, i32, i32, i32
  }
  func.func @transform_3(%arg0: i32) -> (i32, i32, i32) {
    %c0_i32 = arith.constant 0 : i32
    %c0_i32_0 = arith.constant 0 : i32
    %c0_i32_1 = arith.constant 0 : i32
    %c0_i32_2 = arith.constant 0 : i32
    return %c0_i32, %c0_i32_0, %c0_i32_1 : i32, i32, i32
  }
  func.func @transform_4(%arg0: i32) -> (i32, i32, i32, i32) {
    %c0_i32 = arith.constant 0 : i32
    %c0_i32_0 = arith.constant 0 : i32
    %c0_i32_1 = arith.constant 0 : i32
    %c0_i32_2 = arith.constant 0 : i32
    %c0_i32_3 = arith.constant 0 : i32
    return %c0_i32, %c0_i32_0, %c0_i32_1, %c0_i32_2 : i32, i32, i32, i32
  }
  func.func @transform_5(%arg0: i32) -> (i32, i32, i32) {
    %c0_i32 = arith.constant 0 : i32
    %c0_i32_0 = arith.constant 0 : i32
    %c0_i32_1 = arith.constant 0 : i32
    %c0_i32_2 = arith.constant 0 : i32
    return %c0_i32, %c0_i32_0, %c0_i32_1 : i32, i32, i32
  }
  func.func @transform_6(%arg0: i32) -> (i32, i32, i32) {
    %c0_i32 = arith.constant 0 : i32
    %c0_i32_0 = arith.constant 0 : i32
    %c0_i32_1 = arith.constant 0 : i32
    %c0_i32_2 = arith.constant 0 : i32
    return %c0_i32, %c0_i32_0, %c0_i32_1 : i32, i32, i32
  }
  func.func @transform_7(%arg0: i32) -> (i32, i32, i32) {
    %c0_i32 = arith.constant 0 : i32
    %c0_i32_0 = arith.constant 0 : i32
    %c0_i32_1 = arith.constant 0 : i32
    %c0_i32_2 = arith.constant 0 : i32
    return %c0_i32, %c0_i32_0, %c0_i32_1 : i32, i32, i32
  }
  func.func @transform_8(%arg0: i32) -> (i32, i32, i32) {
    %c0_i32 = arith.constant 0 : i32
    %c0_i32_0 = arith.constant 0 : i32
    %c0_i32_1 = arith.constant 0 : i32
    return %arg0, %c0_i32, %c0_i32_0 : i32, i32, i32
  }
}

</mosaic_0001>

<bundles_post_ra>
// kernel: tcn_forward.1
= control target key start
LH: loop header
LB: loop body
LE: loop exit
PB: predicated region body
PF: predicated region fallthrough
CT: control target
= control target key end

     0   :  { %s2299_s27 = smov 0   ;;  %s2624_s0 = inlined_call_operand.vmem [shape: f32[4,8,128], index: 0, kind: input, shape index: {}]   ;;  %s2625_s1 = inlined_call_operand.vmem [shape: f32[1,384], index: 1, kind: input, shape index: {}]   ;;  %s2626_s2 = inlined_call_operand.vmem [shape: f32[3,2,8,8], index: 2, kind: input, shape index: {}]   ;;  %s2627_s3 = inlined_call_operand.vmem [shape: f32[3,8,1], index: 3, kind: input, shape index: {}]   ;;  %s2628_s4 = inlined_call_operand.vmem [shape: f32[3,2,8,8], index: 4, kind: input, shape index: {}]   ;;  %s2629_s5 = inlined_call_operand.vmem [shape: f32[3,8,1], index: 5, kind: input, shape index: {}]   ;;  %s2630_s6 = inlined_call_operand.vmem [shape: f32[2,8,8], index: 6, kind: input, shape index: {}]   ;;  %s2631_s7 = inlined_call_operand.vmem [shape: f32[2,8,1], index: 7, kind: input, shape index: {}]   ;;  %s2632_s8 = inlined_call_operand.vmem [shape: f32[4,8,128], index: 8, kind: output, shape index: {}]  }
   0x1 LB: > { %s2025_s28 = sadd.s32 4294967295, %s2245_s27   ;;  %p2029_p0 = scmp.ge.s32.totalorder %s2245_s27, 1  ;;  %s2245_s27 = sphi %s2299_s27, %s18_s27  }
   0x2   : > { %p263_p1 = scmp.lt.s32.totalorder %s2245_s27, 3 }
   0x4   : > { %p264_p2 = pnand %p2029_p0, %p263_p1 }
   0x5   : > { %s2030_s29 = sshll.u32 (!%p264_p2), %s2025_s28, 1  ;;  %s2248_s30 = smov (!%p264_p2), 1  }
   0x6   : > { %267 = sbr.rel (%p264_p2) target bundleno = 2015 (0x7df), region = 52  ;;  %p298_p3 = scmp.lt.s32.totalorder (!%p264_p2), %s2030_s29, 3 }
   0x7   : > { %s2253_s25 = smov (!%p264_p2), 4  }
   0xb   : > { %v2247_v0 = vmov 0.0|0.0   ;;  %v2249_v1 = vmov 0.0   ;;  %v2250_v2 = vmov 0   ;;  %s2634_s29 = smov (!%p298_p3, %s2030_s29), 3  ;;  %vm2251_vm0 = vmmov 0   ;;  %v322_v7 = vld [vmem:[%s2627_s3] sm:$0xff] }
   0xc   : > { %340 = vrot.lane.b32.xlu1 %v2247_v0, %s2248_s30  ;;  %336 = vrot.lane.b32.xlu0 %v2247_v0, %s2248_s30  ;;  %s2031_s9 = sshll.u32 %s2634_s29, 3  ;;  %vm344_vm1 = vcmask 7168   ;;  %vm352_vm2 = vcmask 1043456   ;;  %v320_v10 = vld [vmem:[%s2626_s2] sm:$0xff]  ;;  %vm348_vm3 = vcmask 64512   ;;  %v321_v21 = vld [vmem:[%s2626_s2 + $0x8] sm:$0xff]  ;;  %v552_v23 = vlaneseq }
   0xd   : > { %2126 = vmatprep.subr.bf16.mxu1 %v2249_v1  ;;  %394 = vmatprep.mubr.bf16.mxu0 %v2250_v2  ;;  %s301_s12 = scalar_lea.vmem %s2624_s0, %s2031_s9  ;;  %v327_v18 = vpack.c.bf16 %v320_v10, %v320_v10  ;;  %v451_v22 = vpack.c.bf16 %v321_v21, %v321_v21  ;;  %v319_v28 = vld [vmem:[%s2625_s1] sm:$0x7]  ;;  %vm943_vm4 = vcmask 15360   ;;  %vm1422_vm5 = vcmask 31744  }
   0xe   : > { %2128 = vmatprep.mubr.msk.bf16.mxu1 %vm2251_vm0, %v2249_v1  ;;  %2237 = vset.pattern.permute.xlu0 %v2250_v2  ;;  %v2034_v3 = vld [vmem:[%s301_s12 + $0x8] sm:$0xff]  ;;  %v314_v4 = vld [vmem:[%s301_s12] sm:$0xff]  ;;  %v553_v24 = vshrl.u32 %v552_v23, 7  ;;  %s2252_s12 = smov 2  }
   0xf   : > { %2238 = vset.pattern.permute.xlu1 %v2250_v2  ;;  %v331_v5 = vpack.c.bf16 %v2034_v3, %v2034_v3  ;;  %v329_v6 = vpack.c.bf16 %v314_v4, %v314_v4  ;;  %v575_v57 = vld [vmem:[%s2629_s5] sm:$0xff] }
  0x10   : > { %v558_v25 = vsub.s32 1, %v553_v24  ;;  %v554_v37 = vsub.s32 0, %v553_v24  ;;  %v562_v43 = vsub.s32 2, %v553_v24  ;;  %v809_v3 = vld [vmem:[%s2631_s7] sm:$0xff] }
  0x11   : > { %342 = vrot.lane.b32.xlu1 %v331_v5, %s2248_s30  ;;  %338 = vrot.lane.b32.xlu0 %v329_v6, %s2248_s30  ;;  %v2344_v19 = vsel %vm352_vm2, %v329_v6, 0  ;;  %v2347_v20 = vsel %vm352_vm2, %v331_v5, 0  ;;  %v573_v5 = vld [vmem:[%s2628_s4] sm:$0xff] }
  0x12   : > { %v2369_v33 = vrot.slane %v319_v28, %v558_v25  ;;  %v2372_v48 = vrot.slane %v319_v28, %v554_v37  ;;  %v2374_v54 = vrot.slane %v319_v28, %v562_v43  ;;  %v804_v21 = vld [vmem:[%s2630_s6] sm:$0xff] }
  0x15   : > { %445 = vperm.xlu0 %2237, %v322_v7   ;;  %589 = vrot.lane.b32.xlu1 %v2247_v0, %s2248_s30 }
  0x7e   : > { %v341_v8 = vpop.permute.xlu1 %340  ;;  %v337_v9 = vpop.permute.xlu0 %336 }
  0x83   : > { %v343_v11 = vpop.permute.xlu1 %342  ;;  %v339_v12 = vpop.permute.xlu0 %338 }
  0x84   : > { %v346_v13 = vsel %vm344_vm1, %v339_v12, %v341_v8  ;;  %v345_v14 = vsel %vm344_vm1, %v337_v9, %v339_v12  ;;  %v347_v15 = vsel %vm344_vm1, %v341_v8, %v343_v11  ;;  %v580_v11 = vpack.c.bf16 %v573_v5, %v573_v5 }
  0x85   : > { %2035 = vmatprep.subr.msk.bf16.mxu0 %vm352_vm2, %v346_v13  ;;  %v354_v16 = vsel %vm352_vm2, %v345_v14, 0  ;;  %v360_v17 = vsel %vm352_vm2, %v347_v15, 0 }
  0x86   : > { %377 = vmatpush1.bf16.msra.mxu0 %v354_v16  ;;  %2127 = vmatpush3.bf16.msra.mxu1 %v360_v17  ;;  %v574_v16 = vld [vmem:[%s2628_s4 + $0x8] sm:$0xff] }
  0x87   : > { %2132 = vmatprep.subr.bf16.mxu0 %v2249_v1  ;;  %2138 = vmatprep.subr.bf16.mxu1 %v2249_v1  ;;  %v590_v4 = vpop.permute.xlu1 %589 }
  0x89   : > { %2036 = vmatmul.mubr.msk.bf16.vlgmr.msra.gmra.mxu0 %vm348_vm3, %v327_v18  ;;  %2129 = vmatmul.mubr.msk.bf16.vlgmr.msra.gmra.mxu1 %vm348_vm3, %v327_v18  ;;  %v701_v18 = vpack.c.bf16 %v574_v16, %v574_v16 }
  0x8a   : > { %2133 = vmatpush3.bf16.msra.mxu0 %v2344_v19  ;;  %2139 = vmatpush3.bf16.msra.mxu1 %v2347_v20 }
  0x8b   : > { %2134 = vmatprep.mubr.msk.bf16.mxu0 %vm2251_vm0, %v2249_v1  ;;  %2140 = vmatprep.mubr.msk.bf16.mxu1 %vm2251_vm0, %v2249_v1 }
  0x8c   : > { %2144 = vmatprep.subr.bf16.mxu1 %v2249_v1 }
  0x90   : > { %v446_v29 = vpop.permute.xlu0 %445 }
  0x91   : > { %2135 = vmatmul.mubr.msk.bf16.vlgmr.msra.gmra.mxu0 %vm348_vm3, %v451_v22  ;;  %2141 = vmatmul.mubr.msk.bf16.vlgmr.msra.gmra.mxu1 %vm348_vm3, %v451_v22  ;;  %v805_v22 = vpack.c.bf16 %v804_v21, %v804_v21 }
  0x92   : > { %644 = vmatprep.mubr.bf16.mxu0 %v2250_v2  ;;  %2146 = vmatprep.mubr.msk.bf16.mxu1 %vm2251_vm0, %v2249_v1 }
 0x149   : > { %v396_v26 = vpop.f32.mrf.mxu0  ;;  %v437_v27 = vpop.f32.mrf.mxu1 }
 0x14a   : > { %v450_v38 = vadd.f32 %v446_v29, %v437_v27  ;;  %v448_v42 = vadd.f32 %v446_v29, %v396_v26 }
 0x14b   : > { %v398_v30 = vpop.f32.mrf.mxu0  ;;  %v2130_v31 = vpop.f32.mrf.mxu1 }
 0x14c   : > { %v449_v32 = vadd.f32 %v446_v29, %v398_v30 }
 0x14d   : > { %v400_v34 = vpop.f32.mrf.mxu0  ;;  %v440_v35 = vpop.f32.mrf.mxu1 }
 0x14e   : > { %v549_v36 = vmax.f32 %v449_v32, 0.0 }
 0x14f   : > { %v401_v39 = vpop.f32.mrf.mxu0  ;;  %v2131_v40 = vpop.f32.mrf.mxu1 }
 0x150   : > { %v568_v41 = vmul.f32 %v2369_v33, %v549_v36 }
 0x151   : > { %v498_v44 = vpop.f32.mrf.mxu0  ;;  %v539_v45 = vpop.f32.mrf.mxu1 }
 0x152   : > { %v583_v46 = vpack.c.bf16 %v568_v41, %v568_v41  ;;  %v545_v47 = vadd.f32 %v498_v44, %v448_v42  ;;  %v547_v49 = vadd.f32 %v539_v45, %v450_v38 }
 0x153   : > { %v2136_v50 = vpop.f32.mrf.mxu0  ;;  %v2142_v51 = vpop.f32.mrf.mxu1 }
 0x154   : > { %v548_v52 = vmax.f32 %v545_v47, 0.0  ;;  %v550_v53 = vmax.f32 %v547_v49, 0.0  ;;  %593 = vrot.lane.b32.xlu0 %v583_v46, %s2248_s30 }
 0x155   : > { %v502_v55 = vpop.f32.mrf.mxu0  ;;  %v542_v56 = vpop.f32.mrf.mxu1 }
 0x156   : > { %v567_v58 = vmul.f32 %v2372_v48, %v548_v52  ;;  %v569_v62 = vmul.f32 %v2374_v54, %v550_v53 }
 0x157   : > { %v2137_v59 = vpop.f32.mrf.mxu0  ;;  %v2143_v60 = vpop.f32.mrf.mxu1 }
 0x158   : > { %v582_v61 = vpack.c.bf16 %v567_v58, %v567_v58  ;;  %695 = vperm.xlu0 %2237, %v575_v57   ;;  %v584_v63 = vpack.c.bf16 %v569_v62, %v569_v62 }
 0x15a   : > { %591 = vrot.lane.b32.xlu1 %v582_v61, %s2248_s30  ;;  %v706_v15 = vsel %vm352_vm2, %v582_v61, 0  ;;  %v712_v17 = vsel %vm352_vm2, %v584_v63, 0 }
 0x15c   : > { %935 = vrot.lane.b32.xlu0 %v2247_v0, %s2252_s12 }
 0x15e   : > { %595 = vrot.lane.b32.xlu1 %v584_v63, %s2248_s30 }
 0x162   : > { %812 = vperm.xlu1 %2238, %v809_v3   ;;  %v2052_v3 = vld [vmem:[%s2627_s3 + $0x8] sm:$0xff] }
 0x1c6   : > { %v594_v6 = vpop.permute.xlu0 %593 }
 0x1cc   : > { %v592_v7 = vpop.permute.xlu1 %591 }
 0x1cd   : > { %v597_v8 = vsel %vm344_vm1, %v590_v4, %v592_v7  ;;  %v598_v9 = vsel %vm344_vm1, %v592_v7, %v594_v6 }
 0x1ce   : > { %v604_v10 = vsel %vm352_vm2, %v597_v8, 0  ;;  %2041 = vmatprep.subr.msk.bf16.mxu0 %vm352_vm2, %v598_v9 }
 0x1cf   : > { %627 = vmatpush1.bf16.msra.mxu0 %v604_v10 }
 0x1d0   : > { %2044 = vmatprep.subr.msk.bf16.mxu0 %vm352_vm2, %v583_v46  ;;  %v596_v12 = vpop.permute.xlu1 %595 }
 0x1d1   : > { %v599_v13 = vsel %vm344_vm1, %v594_v6, %v596_v12 }
 0x1d2   : > { %v610_v14 = vsel %vm352_vm2, %v599_v13, 0  ;;  %2042 = vmatmul.mubr.msk.bf16.vlgmr.msra.gmra.mxu0 %vm348_vm3, %v580_v11 }
 0x1d3   : > { %2145 = vmatpush3.bf16.msra.mxu1 %v610_v14  ;;  %729 = vmatpush1.bf16.msra.mxu0 %v706_v15  ;;  %v696_v27 = vpop.permute.xlu0 %695 }
 0x1d4   : > { %2150 = vmatprep.subr.bf16.mxu1 %v2249_v1  ;;  %746 = vmatprep.mubr.bf16.mxu0 %v2250_v2 }
 0x1d5   : > { %2156 = vmatprep.subr.bf16.mxu0 %v2249_v1 }
 0x1d6   : > { %2147 = vmatmul.mubr.msk.bf16.vlgmr.msra.gmra.mxu1 %vm348_vm3, %v580_v11  ;;  %v2050_v11 = vld [vmem:[%s2626_s2 + $0x10] sm:$0xff] }
 0x1d7   : > { %2151 = vmatpush3.bf16.msra.mxu1 %v712_v17  ;;  %2152 = vmatprep.mubr.msk.bf16.mxu1 %vm2251_vm0, %v2249_v1  ;;  %v936_v10 = vpop.permute.xlu0 %935  ;;  %v926_v17 = vpack.c.bf16 %v2050_v11, %v2050_v11 }
 0x1d8   : > { %2162 = vmatprep.subr.bf16.mxu1 %v2249_v1 }
 0x1da   : > { %2045 = vmatmul.mubr.msk.bf16.vlgmr.msra.gmra.mxu0 %vm348_vm3, %v701_v18 }
 0x1db   : > { %2157 = vmatpush3.bf16.msra.mxu0 %v2344_v19  ;;  %2158 = vmatprep.mubr.msk.bf16.mxu0 %vm2251_vm0, %v2249_v1 }
 0x1dd   : > { %v813_v36 = vpop.permute.xlu1 %812 }
 0x1de   : > { %2153 = vmatmul.mubr.msk.bf16.vlgmr.msra.gmra.mxu1 %vm348_vm3, %v701_v18 }
 0x1df   : > { %2163 = vmatpush3.bf16.msra.mxu1 %v2347_v20  ;;  %2164 = vmatprep.mubr.msk.bf16.mxu1 %vm2251_vm0, %v2249_v1 }
 0x1e0   : > { %2168 = vmatprep.subr.bf16.mxu1 %v2249_v1 }
 0x1e2   : > { %2159 = vmatmul.mubr.msk.bf16.vlgmr.msra.gmra.mxu0 %vm348_vm3, %v805_v22 }
 0x1e3   : > { %991 = vmatprep.mubr.bf16.mxu0 %v2250_v2 }
 0x1e6   : > { %2165 = vmatmul.mubr.msk.bf16.vlgmr.msra.gmra.mxu1 %vm348_vm3, %v805_v22 }
 0x1e7   : > { %2170 = vmatprep.mubr.msk.bf16.mxu1 %vm2251_vm0, %v2249_v1 }
 0x292   : > { %v646_v19 = vpop.f32.mrf.mxu0 }
 0x293   : > { %v698_v34 = vadd.f32 %v696_v27, %v646_v19 }
 0x294   : > { %v648_v20 = vpop.f32.mrf.mxu0 }
 0x295   : > { %v699_v30 = vadd.f32 %v696_v27, %v648_v20  ;;  %v2051_v20 = vld [vmem:[%s2626_s2 + $0x18] sm:$0xff] }
 0x296   : > { %v650_v23 = vpop.f32.mrf.mxu0  ;;  %v687_v24 = vpop.f32.mrf.mxu1 }
 0x297   : > { %v700_v43 = vadd.f32 %v696_v27, %v687_v24  ;;  %v1048_v24 = vpack.c.bf16 %v2051_v20, %v2051_v20 }
 0x298   : > { %v651_v25 = vpop.f32.mrf.mxu0  ;;  %v2148_v26 = vpop.f32.mrf.mxu1 }
 0x29a   : > { %v690_v28 = vpop.f32.mrf.mxu1  ;;  %v748_v29 = vpop.f32.mrf.mxu0 }
 0x29b   : > { %v795_v39 = vadd.f32 %v748_v29, %v698_v34 }
 0x29c   : > { %v2149_v31 = vpop.f32.mrf.mxu1  ;;  %v750_v32 = vpop.f32.mrf.mxu0 }
 0x29d   : > { %v796_v35 = vadd.f32 %v750_v32, %v699_v30  ;;  %v798_v47 = vmax.f32 %v795_v39, 0.0 }
 0x29e   : > { %v752_v37 = vpop.f32.mrf.mxu0  ;;  %v789_v38 = vpop.f32.mrf.mxu1 }
 0x29f   : > { %v799_v40 = vmax.f32 %v796_v35, 0.0  ;;  %v797_v49 = vadd.f32 %v789_v38, %v700_v43 }
 0x2a0   : > { %v2154_v41 = vpop.f32.mrf.mxu1  ;;  %v753_v42 = vpop.f32.mrf.mxu0 }
 0x2a1   : > { %v909_v44 = vadd.f32 %v813_v36, %v799_v40  ;;  %v800_v59 = vmax.f32 %v797_v49, 0.0 }
 0x2a2   : > { %v792_v45 = vpop.f32.mrf.mxu1  ;;  %v861_v46 = vpop.f32.mrf.mxu0 }
 0x2a3   : > { %v2430_v50 = vmul.f32 %v909_v44, %v2369_v33  ;;  %v862_v51 = vadd.f32 %v861_v46, %v813_v36 }
 0x2a4   : > { %v2155_v52 = vpop.f32.mrf.mxu1  ;;  %v2160_v53 = vpop.f32.mrf.mxu0 }
 0x2a5   : > { %v908_v55 = vadd.f32 %v862_v51, %v798_v47  ;;  %v929_v56 = vpack.c.bf16 %v2430_v50, %v2430_v50 }
 0x2a6   : > { %v865_v57 = vpop.f32.mrf.mxu0  ;;  %v902_v58 = vpop.f32.mrf.mxu1 }
 0x2a7   : > { %v2435_v60 = vmul.f32 %v908_v55, %v2372_v48  ;;  %v903_v61 = vadd.f32 %v902_v58, %v813_v36  ;;  %939 = vrot.lane.b32.xlu0 %v929_v56, %s2252_s12 }
 0x2a8   : > { %v2161_v62 = vpop.f32.mrf.mxu0  ;;  %v2166_v63 = vpop.f32.mrf.mxu1 }
 0x2a9   : > { %v910_v4 = vadd.f32 %v903_v61, %v800_v59  ;;  %v928_v5 = vpack.c.bf16 %v2435_v60, %v2435_v60  ;;  %v2061_v62 = vld [vmem:[%s2629_s5 + $0x8] sm:$0xff] }
 0x2aa   : > { %v905_v6 = vpop.f32.mrf.mxu1 }
 0x2ab   : > { %v2444_v7 = vmul.f32 %v910_v4, %v2374_v54  ;;  %1042 = vperm.xlu0 %2237, %v2052_v3   ;;  %937 = vrot.lane.b32.xlu1 %v928_v5, %s2252_s12  ;;  %v1053_v19 = vsel %vm352_vm2, %v928_v5, 0  ;;  %v2059_v5 = vld [vmem:[%s2628_s4 + $0x10] sm:$0xff] }
 0x2ac   : > { %v2167_v8 = vpop.f32.mrf.mxu1  ;;  %v1163_v11 = vpack.c.bf16 %v2059_v5, %v2059_v5 }
 0x2ad   : > { %v930_v9 = vpack.c.bf16 %v2444_v7, %v2444_v7 }
 0x2af   : > { %941 = vrot.lane.b32.xlu1 %v930_v9, %s2252_s12  ;;  %v1059_v23 = vsel %vm352_vm2, %v930_v9, 0 }
 0x2b3   : > { %1172 = vrot.lane.b32.xlu1 %v2247_v0, %s2252_s12 }
 0x319   : > { %v940_v12 = vpop.permute.xlu0 %939 }
 0x31d   : > { %v938_v13 = vpop.permute.xlu1 %937 }
 0x31e   : > { %v944_v14 = vsel %vm943_vm4, %v936_v10, %v938_v13  ;;  %v945_v15 = vsel %vm943_vm4, %v938_v13, %v940_v12 }
 0x31f   : > { %v951_v16 = vsel %vm352_vm2, %v944_v14, 0  ;;  %2053 = vmatprep.subr.msk.bf16.mxu0 %vm352_vm2, %v945_v15  ;;  %v2060_v15 = vld [vmem:[%s2628_s4 + $0x18] sm:$0xff] }
 0x320   : > { %974 = vmatpush1.bf16.msra.mxu0 %v951_v16 }
 0x321   : > { %2056 = vmatprep.subr.msk.bf16.mxu0 %vm352_vm2, %v929_v56  ;;  %v942_v18 = vpop.permute.xlu1 %941 }
 0x322   : > { %v946_v21 = vsel %vm943_vm4, %v940_v12, %v942_v18 }
 0x323   : > { %v957_v22 = vsel %vm352_vm2, %v946_v21, 0  ;;  %2054 = vmatmul.mubr.msk.bf16.vlgmr.msra.gmra.mxu0 %vm348_vm3, %v926_v17 }
 0x324   : > { %2169 = vmatpush3.bf16.msra.mxu1 %v957_v22  ;;  %1076 = vmatpush1.bf16.msra.mxu0 %v1053_v19 }
 0x325   : > { %2174 = vmatprep.subr.bf16.mxu1 %v2249_v1  ;;  %1093 = vmatprep.mubr.bf16.mxu0 %v2250_v2  ;;  %v1173_v63 = vpop.permute.xlu1 %1172 }
 0x326   : > { %v1043_v29 = vpop.permute.xlu0 %1042 }
 0x327   : > { %2171 = vmatmul.mubr.msk.bf16.vlgmr.msra.gmra.mxu1 %vm348_vm3, %v926_v17  ;;  %v1284_v17 = vpack.c.bf16 %v2060_v15, %v2060_v15 }
 0x328   : > { %2175 = vmatpush3.bf16.msra.mxu1 %v1059_v23  ;;  %2176 = vmatprep.mubr.msk.bf16.mxu1 %vm2251_vm0, %v2249_v1 }
 0x329   : > { %2180 = vmatprep.subr.bf16.mxu1 %v2249_v1 }
 0x32b   : > { %2057 = vmatmul.mubr.msk.bf16.vlgmr.msra.gmra.mxu0 %vm348_vm3, %v1048_v24 }
 0x32c   : > { %1227 = vmatprep.mubr.bf16.mxu0 %v2250_v2 }
 0x32f   : > { %2177 = vmatmul.mubr.msk.bf16.vlgmr.msra.gmra.mxu1 %vm348_vm3, %v1048_v24 }
 0x330   : > { %2182 = vmatprep.mubr.msk.bf16.mxu1 %vm2251_vm0, %v2249_v1 }
 0x3e3   : > { %v993_v25 = vpop.f32.mrf.mxu0 }
 0x3e4   : > { %v1045_v32 = vadd.f32 %v1043_v29, %v993_v25 }
 0x3e5   : > { %v995_v26 = vpop.f32.mrf.mxu0 }
 0x3e6   : > { %v1046_v36 = vadd.f32 %v1043_v29, %v995_v26 }
 0x3e7   : > { %v997_v27 = vpop.f32.mrf.mxu0  ;;  %v1034_v28 = vpop.f32.mrf.mxu1 }
 0x3e8   : > { %v1047_v40 = vadd.f32 %v1043_v29, %v1034_v28 }
 0x3e9   : > { %v998_v30 = vpop.f32.mrf.mxu0  ;;  %v2172_v31 = vpop.f32.mrf.mxu1 }
 0x3eb   : > { %v1037_v34 = vpop.f32.mrf.mxu1  ;;  %v1095_v35 = vpop.f32.mrf.mxu0 }
 0x3ec   : > { %v1142_v37 = vadd.f32 %v1095_v35, %v1045_v32 }
 0x3ed   : > { %v2173_v38 = vpop.f32.mrf.mxu1  ;;  %v1097_v39 = vpop.f32.mrf.mxu0 }
 0x3ee   : > { %v1145_v41 = vmax.f32 %v1142_v37, 0.0  ;;  %v1143_v42 = vadd.f32 %v1097_v39, %v1046_v36 }
 0x3ef   : > { %v1099_v43 = vpop.f32.mrf.mxu0  ;;  %v1136_v44 = vpop.f32.mrf.mxu1 }
 0x3f0   : > { %v1148_v45 = vmul.f32 %v1145_v41, %v2372_v48  ;;  %v1146_v46 = vmax.f32 %v1143_v42, 0.0  ;;  %v1144_v47 = vadd.f32 %v1136_v44, %v1047_v40 }
 0x3f1   : > { %v1100_v49 = vpop.f32.mrf.mxu0  ;;  %v2178_v51 = vpop.f32.mrf.mxu1 }
 0x3f2   : > { %v1165_v52 = vpack.c.bf16 %v1148_v45, %v1148_v45  ;;  %v1149_v53 = vmul.f32 %v1146_v46, %v2369_v33  ;;  %v1147_v55 = vmax.f32 %v1144_v47, 0.0 }
 0x3f3   : > { %v1139_v56 = vpop.f32.mrf.mxu1 }
 0x3f4   : > { %v1166_v57 = vpack.c.bf16 %v1149_v53, %v1149_v53  ;;  %v1150_v58 = vmul.f32 %v1147_v55, %v2374_v54  ;;  %1174 = vrot.lane.b32.xlu0 %v1165_v52, %s2252_s12  ;;  %v1289_v14 = vsel %vm352_vm2, %v1165_v52, 0 }
 0x3f5   : > { %v2179_v59 = vpop.f32.mrf.mxu1 }
 0x3f6   : > { %v1167_v61 = vpack.c.bf16 %v1150_v58, %v1150_v58  ;;  %1176 = vrot.lane.b32.xlu1 %v1166_v57, %s2252_s12  ;;  %v2068_v58 = vld [vmem:[%s2626_s2 + $0x20] sm:$0xff] }
 0x3f8   : > { %1178 = vrot.lane.b32.xlu0 %v1167_v61, %s2252_s12  ;;  %v1295_v16 = vsel %vm352_vm2, %v1167_v61, 0 }
 0x3fa   : > { %1278 = vperm.xlu1 %2238, %v2061_v62  }
 0x3fc   : > { %1414 = vrot.lane.b32.xlu0 %v2247_v0, %s2253_s25 }
 0x466   : > { %v1175_v3 = vpop.permute.xlu0 %1174 }
 0x467   : > { %v1180_v4 = vsel %vm943_vm4, %v1173_v63, %v1175_v3 }
 0x468   : > { %v1177_v6 = vpop.permute.xlu1 %1176  ;;  %v1187_v9 = vsel %vm352_vm2, %v1180_v4, 0 }
 0x469   : > { %v1181_v8 = vsel %vm943_vm4, %v1175_v3, %v1177_v6  ;;  %v1405_v3 = vpack.c.bf16 %v2068_v58, %v2068_v58  ;;  %v2086_v58 = vld [vmem:[%s2630_s6 + $0x8] sm:$0xff] }
 0x46a   : > { %v1179_v10 = vpop.permute.xlu0 %1178  ;;  %2062 = vmatprep.subr.msk.bf16.mxu0 %vm352_vm2, %v1181_v8 }
 0x46b   : > { %v1182_v12 = vsel %vm943_vm4, %v1177_v6, %v1179_v10  ;;  %1210 = vmatpush1.bf16.msra.mxu0 %v1187_v9  ;;  %v2069_v6 = vld [vmem:[%s2626_s2 + $0x28] sm:$0xff] }
 0x46c   : > { %v1193_v13 = vsel %vm352_vm2, %v1182_v12, 0  ;;  %2065 = vmatprep.subr.msk.bf16.mxu0 %vm352_vm2, %v1166_v57  ;;  %v1527_v9 = vpack.c.bf16 %v2069_v6, %v2069_v6 }
 0x46d   : > { %2181 = vmatpush3.bf16.msra.mxu1 %v1193_v13 }
 0x46e   : > { %2063 = vmatmul.mubr.msk.bf16.vlgmr.msra.gmra.mxu0 %vm348_vm3, %v1163_v11  ;;  %2186 = vmatprep.subr.bf16.mxu1 %v2249_v1 }
 0x46f   : > { %1312 = vmatpush1.bf16.msra.mxu0 %v1289_v14  ;;  %1329 = vmatprep.mubr.bf16.mxu0 %v2250_v2 }
 0x470   : > { %2183 = vmatmul.mubr.msk.bf16.vlgmr.msra.gmra.mxu1 %vm348_vm3, %v1163_v11 }
 0x471   : > { %2187 = vmatpush3.bf16.msra.mxu1 %v1295_v16  ;;  %2188 = vmatprep.mubr.msk.bf16.mxu1 %vm2251_vm0, %v2249_v1 }
 0x472   : > { %2192 = vmatprep.subr.bf16.mxu1 %v2249_v1 }
 0x475   : > { %v1279_v23 = vpop.permute.xlu1 %1278 }
 0x476   : > { %2066 = vmatmul.mubr.msk.bf16.vlgmr.msra.gmra.mxu0 %vm348_vm3, %v1284_v17 }
 0x477   : > { %1470 = vmatprep.mubr.bf16.mxu0 %v2250_v2 }
 0x478   : > { %2189 = vmatmul.mubr.msk.bf16.vlgmr.msra.gmra.mxu1 %vm348_vm3, %v1284_v17 }
 0x479   : > { %2194 = vmatprep.mubr.msk.bf16.mxu1 %vm2251_vm0, %v2249_v1 }
 0x52e   : > { %v1229_v18 = vpop.f32.mrf.mxu0 }
 0x52f   : > { %v1281_v26 = vadd.f32 %v1279_v23, %v1229_v18 }
 0x530   : > { %v1231_v21 = vpop.f32.mrf.mxu0  ;;  %v1270_v22 = vpop.f32.mrf.mxu1 }
 0x531   : > { %v1282_v29 = vadd.f32 %v1279_v23, %v1231_v21  ;;  %v1283_v30 = vadd.f32 %v1279_v23, %v1270_v22 }
 0x532   : > { %v1233_v19 = vpop.f32.mrf.mxu0  ;;  %v2184_v20 = vpop.f32.mrf.mxu1 }
 0x534   : > { %v1234_v24 = vpop.f32.mrf.mxu0  ;;  %v1273_v25 = vpop.f32.mrf.mxu1 }
 0x536   : > { %v2185_v27 = vpop.f32.mrf.mxu1  ;;  %v1331_v28 = vpop.f32.mrf.mxu0 }
 0x537   : > { %v1378_v31 = vadd.f32 %v1331_v28, %v1281_v26 }
 0x538   : > { %v1333_v32 = vpop.f32.mrf.mxu0  ;;  %v1372_v34 = vpop.f32.mrf.mxu1 }
 0x539   : > { %v1381_v35 = vmax.f32 %v1378_v31, 0.0  ;;  %v1379_v36 = vadd.f32 %v1333_v32, %v1282_v29  ;;  %v1380_v37 = vadd.f32 %v1372_v34, %v1283_v30 }
 0x53a   : > { %v1335_v38 = vpop.f32.mrf.mxu0  ;;  %v2190_v39 = vpop.f32.mrf.mxu1 }
 0x53b   : > { %v1387_v40 = vadd.f32 %v1381_v35, %v2435_v60  ;;  %v1382_v41 = vmax.f32 %v1379_v36, 0.0  ;;  %v1383_v42 = vmax.f32 %v1380_v37, 0.0 }
 0x53c   : > { %v1336_v43 = vpop.f32.mrf.mxu0  ;;  %v1375_v44 = vpop.f32.mrf.mxu1 }
 0x53d   : > { %v1388_v45 = vadd.f32 %v1382_v41, %v2430_v50  ;;  %v1389_v46 = vadd.f32 %v1383_v42, %v2444_v7  ;;  %v1390_v47 = vmul.f32 %v1387_v40, %v2372_v48  ;;  %v2070_v50 = vld [vmem:[%s2627_s3 + $0x10] sm:$0xff]  ;;  %v1415_v7 = vpop.permute.xlu0 %1414  ;;  %v2087_v43 = vld [vmem:[%s2631_s7 + $0x8] sm:$0xff] }
 0x53e   : > { %v2191_v49 = vpop.f32.mrf.mxu1 }
 0x53f   : > { %v1407_v51 = vpack.c.bf16 %v1390_v47, %v1390_v47  ;;  %v1391_v52 = vmul.f32 %v1388_v45, %v2369_v33  ;;  %v1392_v53 = vmul.f32 %v1389_v46, %v2374_v54  ;;  %v2077_v45 = vld [vmem:[%s2628_s4 + $0x20] sm:$0xff] }
 0x541   : > { %1416 = vrot.lane.b32.xlu1 %v1407_v51, %s2253_s25  ;;  %v2524_v55 = vpack.c.bf16 %v1391_v52, %v1391_v52  ;;  %v1409_v60 = vpack.c.bf16 %v1392_v53, %v1392_v53  ;;  %v2547_v5 = vsel %vm352_vm2, %v1407_v51, 0  ;;  %v1642_v52 = vpack.c.bf16 %v2077_v45, %v2077_v45 }
 0x543   : > { %1418 = vrot.lane.b32.xlu0 %v2524_v55, %s2253_s25  ;;  %v2557_v8 = vsel %vm352_vm2, %v1409_v60, 0 }
 0x545   : > { %1420 = vrot.lane.b32.xlu1 %v1409_v60, %s2253_s25 }
 0x547   : > { %1521 = vperm.xlu0 %2237, %v2070_v50  }
 0x549   : > { %1651 = vrot.lane.b32.xlu1 %v2247_v0, %s2253_s25 }
 0x5b3   : > { %v1417_v56 = vpop.permute.xlu1 %1416 }
 0x5b4   : > { %v1423_v57 = vsel %vm1422_vm5, %v1415_v7, %v1417_v56  ;;  %v2078_v7 = vld [vmem:[%s2628_s4 + $0x28] sm:$0xff] }
 0x5b5   : > { %v1419_v59 = vpop.permute.xlu0 %1418  ;;  %v1430_v62 = vsel %vm352_vm2, %v1423_v57, 0  ;;  %v1761_v57 = vpack.c.bf16 %v2078_v7, %v2078_v7 }
 0x5b6   : > { %v1424_v61 = vsel %vm1422_vm5, %v1417_v56, %v1419_v59 }
 0x5b7   : > { %v1421_v63 = vpop.permute.xlu1 %1420  ;;  %2071 = vmatprep.subr.msk.bf16.mxu0 %vm352_vm2, %v1424_v61 }
 0x5b8   : > { %v1425_v0 = vsel %vm1422_vm5, %v1419_v59, %v1421_v63  ;;  %1453 = vmatpush1.bf16.msra.mxu0 %v1430_v62 }
 0x5b9   : > { %v1436_v4 = vsel %vm352_vm2, %v1425_v0, 0  ;;  %2074 = vmatprep.subr.msk.bf16.mxu0 %vm352_vm2, %v2524_v55 }
 0x5ba   : > { %2193 = vmatpush3.bf16.msra.mxu1 %v1436_v4 }
 0x5bb   : > { %2072 = vmatmul.mubr.msk.bf16.vlgmr.msra.gmra.mxu0 %vm348_vm3, %v1405_v3  ;;  %2198 = vmatprep.subr.bf16.mxu1 %v2249_v1 }
 0x5bc   : > { %1555 = vmatpush1.bf16.msra.mxu0 %v2547_v5  ;;  %1572 = vmatprep.mubr.bf16.mxu0 %v2250_v2 }
 0x5bd   : > { %2195 = vmatmul.mubr.msk.bf16.vlgmr.msra.gmra.mxu1 %vm348_vm3, %v1405_v3 }
 0x5be   : > { %2199 = vmatpush3.bf16.msra.mxu1 %v2557_v8  ;;  %2200 = vmatprep.mubr.msk.bf16.mxu1 %vm2251_vm0, %v2249_v1 }
 0x5bf   : > { %2204 = vmatprep.subr.bf16.mxu1 %v2249_v1 }
 0x5c2   : > { %v1522_v15 = vpop.permute.xlu0 %1521 }
 0x5c3   : > { %2075 = vmatmul.mubr.msk.bf16.vlgmr.msra.gmra.mxu0 %vm348_vm3, %v1527_v9 }
 0x5c4   : > { %1706 = vmatprep.mubr.bf16.mxu0 %v2250_v2 }
 0x5c5   : > { %2201 = vmatmul.mubr.msk.bf16.vlgmr.msra.gmra.mxu1 %vm348_vm3, %v1527_v9 }
 0x5c6   : > { %2206 = vmatprep.mubr.msk.bf16.mxu1 %vm2251_vm0, %v2249_v1 }
 0x67b   : > { %v1472_v10 = vpop.f32.mrf.mxu0 }
 0x67c   : > { %v1524_v18 = vadd.f32 %v1522_v15, %v1472_v10 }
 0x67d   : > { %v1474_v11 = vpop.f32.mrf.mxu0  ;;  %v1513_v12 = vpop.f32.mrf.mxu1 }
 0x67e   : > { %v1525_v19 = vadd.f32 %v1522_v15, %v1474_v11  ;;  %v1526_v20 = vadd.f32 %v1522_v15, %v1513_v12 }
 0x67f   : > { %v1476_v13 = vpop.f32.mrf.mxu0  ;;  %v2196_v14 = vpop.f32.mrf.mxu1 }
 0x681   : > { %v1477_v16 = vpop.f32.mrf.mxu0  ;;  %v1516_v17 = vpop.f32.mrf.mxu1 }
 0x683   : > { %v2197_v21 = vpop.f32.mrf.mxu1  ;;  %v1574_v22 = vpop.f32.mrf.mxu0 }
 0x684   : > { %v1621_v23 = vadd.f32 %v1574_v22, %v1524_v18 }
 0x685   : > { %v1576_v24 = vpop.f32.mrf.mxu0  ;;  %v1615_v25 = vpop.f32.mrf.mxu1 }
 0x686   : > { %v1624_v26 = vmax.f32 %v1621_v23, 0.0  ;;  %v1622_v27 = vadd.f32 %v1576_v24, %v1525_v19  ;;  %v1623_v28 = vadd.f32 %v1615_v25, %v1526_v20 }
 0x687   : > { %v1578_v29 = vpop.f32.mrf.mxu0  ;;  %v2202_v30 = vpop.f32.mrf.mxu1 }
 0x688   : > { %v1627_v31 = vmul.f32 %v1624_v26, %v2372_v48  ;;  %v1625_v32 = vmax.f32 %v1622_v27, 0.0  ;;  %v1626_v34 = vmax.f32 %v1623_v28, 0.0  ;;  %v2079_v48 = vld [vmem:[%s2629_s5 + $0x10] sm:$0xff] }
 0x689   : > { %v1579_v35 = vpop.f32.mrf.mxu0  ;;  %v1618_v36 = vpop.f32.mrf.mxu1 }
 0x68a   : > { %v1644_v37 = vpack.c.bf16 %v1627_v31, %v1627_v31  ;;  %v1628_v38 = vmul.f32 %v1625_v32, %v2369_v33  ;;  %v1629_v39 = vmul.f32 %v1626_v34, %v2374_v54  ;;  %v1652_v33 = vpop.permute.xlu1 %1651 }
 0x68b   : > { %v2203_v40 = vpop.f32.mrf.mxu1 }
 0x68c   : > { %v1645_v41 = vpack.c.bf16 %v1628_v38, %v1628_v38  ;;  %1653 = vrot.lane.b32.xlu0 %v1644_v37, %s2253_s25  ;;  %v1646_v42 = vpack.c.bf16 %v1629_v39, %v1629_v39  ;;  %v1766_v50 = vsel %vm352_vm2, %v1644_v37, 0 }
 0x68e   : > { %1655 = vrot.lane.b32.xlu1 %v1645_v41, %s2253_s25  ;;  %v1772_v56 = vsel %vm352_vm2, %v1646_v42, 0 }
 0x690   : > { %1657 = vrot.lane.b32.xlu0 %v1646_v42, %s2253_s25  ;;  %s307_s25 = scalar_lea.vmem %s2632_s8, %s2031_s9 }
 0x692   : > { %1756 = vperm.xlu1 %2238, %v2079_v48  }
 0x694   : > { %1869 = vperm.xlu0 %2237, %v2087_v43  }
 0x6fe   : > { %v1654_v54 = vpop.permute.xlu0 %1653 }
 0x6ff   : > { %v1659_v44 = vsel %vm1422_vm5, %v1652_v33, %v1654_v54 }
 0x700   : > { %v1656_v46 = vpop.permute.xlu1 %1655  ;;  %v1666_v49 = vsel %vm352_vm2, %v1659_v44, 0 }
 0x701   : > { %v1660_v47 = vsel %vm1422_vm5, %v1654_v54, %v1656_v46 }
 0x702   : > { %v1658_v51 = vpop.permute.xlu0 %1657  ;;  %2080 = vmatprep.subr.msk.bf16.mxu0 %vm352_vm2, %v1660_v47 }
 0x703   : > { %v1661_v53 = vsel %vm1422_vm5, %v1656_v46, %v1658_v51  ;;  %1689 = vmatpush1.bf16.msra.mxu0 %v1666_v49 }
 0x704   : > { %v1672_v60 = vsel %vm352_vm2, %v1661_v53, 0  ;;  %2083 = vmatprep.subr.msk.bf16.mxu0 %vm352_vm2, %v1645_v41 }
 0x705   : > { %2205 = vmatpush3.bf16.msra.mxu1 %v1672_v60 }
 0x706   : > { %2081 = vmatmul.mubr.msk.bf16.vlgmr.msra.gmra.mxu0 %vm348_vm3, %v1642_v52  ;;  %2210 = vmatprep.subr.bf16.mxu1 %v2249_v1 }
 0x707   : > { %1789 = vmatpush1.bf16.msra.mxu0 %v1766_v50  ;;  %1806 = vmatprep.mubr.bf16.mxu0 %v2250_v2 }
 0x708   : > { %2207 = vmatmul.mubr.msk.bf16.vlgmr.msra.gmra.mxu1 %vm348_vm3, %v1642_v52  ;;  %2088 = vmatprep.subr.msk.bf16.mxu0 %vm352_vm2, %v2524_v55  ;;  %v1861_v55 = vpack.c.bf16 %v2086_v58, %v2086_v58 }
 0x709   : > { %2211 = vmatpush3.bf16.msra.mxu1 %v1772_v56  ;;  %2212 = vmatprep.mubr.msk.bf16.mxu1 %vm2251_vm0, %v2249_v1 }
 0x70a   : > { %2216 = vmatprep.subr.bf16.mxu1 %v2249_v1 }
 0x70e   : > { %2084 = vmatmul.mubr.msk.bf16.vlgmr.msra.gmra.mxu0 %vm348_vm3, %v1761_v57 }
 0x70f   : > { %1899 = vmatpush1.bf16.msra.mxu0 %v2547_v5  ;;  %1916 = vmatprep.mubr.bf16.mxu0 %v2250_v2  ;;  %v1870_v13 = vpop.permute.xlu0 %1869 }
 0x710   : > { %2213 = vmatmul.mubr.msk.bf16.vlgmr.msra.gmra.mxu1 %vm348_vm3, %v1761_v57 }
 0x711   : > { %2217 = vmatpush3.bf16.msra.mxu1 %v2557_v8  ;;  %2218 = vmatprep.mubr.msk.bf16.mxu1 %vm2251_vm0, %v2249_v1  ;;  %v1757_v1 = vpop.permute.xlu1 %1756 }
 0x716   : > { %2089 = vmatmul.mubr.msk.bf16.vlgmr.msra.gmra.mxu0 %vm348_vm3, %v1861_v55 }
 0x718   : > { %2219 = vmatmul.mubr.msk.bf16.vlgmr.msra.gmra.mxu1 %vm348_vm3, %v1861_v55 }
 0x7c6   : > { %v1708_v59 = vpop.f32.mrf.mxu0 }
 0x7c7   : > { %v1759_v14 = vadd.f32 %v1757_v1, %v1708_v59 }
 0x7c8   : > { %v1710_v61 = vpop.f32.mrf.mxu0  ;;  %v1748_v62 = vpop.f32.mrf.mxu1 }
 0x7c9   : > { %v1760_v17 = vadd.f32 %v1757_v1, %v1748_v62 }
 0x7ca   : > { %v1711_v2 = vpop.f32.mrf.mxu0  ;;  %v2208_v63 = vpop.f32.mrf.mxu1 }
 0x7cc   : > { %v1712_v3 = vpop.f32.mrf.mxu0  ;;  %v1751_v0 = vpop.f32.mrf.mxu1 }
 0x7ce   : > { %v2209_v4 = vpop.f32.mrf.mxu1  ;;  %v1808_v5 = vpop.f32.mrf.mxu0 }
 0x7cf   : > { %v1854_v18 = vadd.f32 %v1808_v5, %v1759_v14 }
 0x7d0   : > { %v1810_v6 = vpop.f32.mrf.mxu0  ;;  %v1848_v8 = vpop.f32.mrf.mxu1 }
 0x7d1   : > { %v1855_v20 = vadd.f32 %v1848_v8, %v1760_v17 }
 0x7d2   : > { %v1811_v9 = vpop.f32.mrf.mxu0  ;;  %v2214_v10 = vpop.f32.mrf.mxu1 }
 0x7d4   : > { %v1812_v11 = vpop.f32.mrf.mxu0  ;;  %v1851_v12 = vpop.f32.mrf.mxu1 }
 0x7d6   : > { %v2215_v15 = vpop.f32.mrf.mxu1  ;;  %v1918_v16 = vpop.f32.mrf.mxu0 }
 0x7d7   : > { %v1919_v21 = vadd.f32 %v1918_v16, %v1870_v13 }
 0x7d8   : > { %v1958_v22 = vpop.f32.mrf.mxu1  ;;  %v1920_v19 = vpop.f32.mrf.mxu0 }
 0x7d9   : > { %v1964_v23 = vadd.f32 %v1919_v21, %v1854_v18  ;;  %v1959_v24 = vadd.f32 %v1958_v22, %v1870_v13 }
 0x7da   : > { %v2220_v25 = vpop.f32.mrf.mxu1  ;;  %v1921_v26 = vpop.f32.mrf.mxu0 }
 0x7db   : > { %1966 = vst [vmem:[%s307_s25] sm:$0xff] %v1964_v23  ;;  %v1965_v27 = vadd.f32 %v1959_v24, %v1855_v20 }
 0x7dc   : > { %v1961_v28 = vpop.f32.mrf.mxu1  ;;  %v1922_v29 = vpop.f32.mrf.mxu0 }
 0x7dd   : > { %2091 = vst [vmem:[%s307_s25 + $0x8] sm:$0xff] %v1965_v27 }
 0x7de   : > { %v2221_v30 = vpop.f32.mrf.mxu1 }
 0x7df PF: > { %s18_s27 = sadd.s32 1, %s2245_s27  }
 0x7e0   : > { %p15_p4 = scmp.ge.s32.totalorder %s18_s27, 4  }
 0x7e2   :  { %17 = sbr.rel (!%p15_p4) target bundleno = 1 (0x1), region = 94 }

</bundles_post_ra>
